<compile_context>
chip_gen: v5e
topology: v5e:2x2
jax: 0.10.0
libtpu: 0.0.40
codegen_flags: <defaults>
</compile_context>

<pallas_src>
import functools

import jax
import jax.numpy as jnp
from jax.experimental import pallas as pl
from jax.experimental.pallas import tpu as pltpu


def _gcn_fused_kernel(a_ref, b_ref, w_ref, o_ref, acc_ref):
    """out_block = (sum_k A[i,k] @ B[k]) @ W   (W is VMEM-resident)."""
    k = pl.program_id(1)

    @pl.when(k == 0)
    def _():
        acc_ref[...] = jnp.zeros_like(acc_ref)

    # (tm, tk) @ (tk, f_mid) -> (tm, f_mid), accumulated in f32.
    acc_ref[...] += jnp.dot(
        a_ref[...], b_ref[...], preferred_element_type=jnp.float32
    )

    @pl.when(k == pl.num_programs(1) - 1)
    def _():
        # Apply the resident weight once per row block:
        # (tm, f_mid) @ (f_mid, f_out) -> (tm, f_out)
        o_ref[...] = jnp.dot(
            acc_ref[...],
            w_ref[...].astype(jnp.float32),
            preferred_element_type=jnp.float32,
        ).astype(o_ref.dtype)


def _stream_matmul_kernel(a_ref, b_ref, o_ref, acc_ref):
    """out_block = sum_k A[i,k] @ B[k]   (B already carries the weight)."""
    k = pl.program_id(1)

    @pl.when(k == 0)
    def _():
        acc_ref[...] = jnp.zeros_like(acc_ref)

    acc_ref[...] += jnp.dot(
        a_ref[...], b_ref[...], preferred_element_type=jnp.float32
    )

    @pl.when(k == pl.num_programs(1) - 1)
    def _():
        o_ref[...] = acc_ref[...].astype(o_ref.dtype)


def _round_up(n, m):
    return ((n + m - 1) // m) * m


@functools.partial(jax.jit, static_argnames=("tm", "tk"))
def gcn_layer_forward(x, a_norm, weight, *, tm=256, tk=1024):
    """GCN layer forward: out = A_norm @ (x @ W)."""
    M, K = a_norm.shape
    K2, f_in = x.shape
    f_in2, f_out = weight.shape
    assert K == K2 and f_in == f_in2

    # Choose the cheaper contraction order (shapes are static at trace time).
    fuse_weight = f_in <= f_out
    if fuse_weight:
        b = x                              # stream x, apply W inside the kernel
        f_mid = f_in
    else:
        # Tiny projection first (2*N*F_in*F_out flops), then stream A @ support.
        b = jnp.dot(x, weight, preferred_element_type=jnp.float32).astype(x.dtype)
        f_mid = f_out

    # Clamp tiles to the (padded) problem size, keeping (8, 128) alignment:
    # tm is a multiple of 8 (or the full padded row dim); tk is a multiple of
    # 128 (or the full padded reduction dim).
    tm = min(tm, _round_up(M, 8))
    tk = min(tk, _round_up(K, 128))
    m_pad = _round_up(M, tm)
    k_pad = _round_up(K, tk)

    # Zero-padding keeps the math exact: padded A rows produce zero output rows
    # (sliced off below); padded A columns hit padded zero rows of b.
    if (m_pad, k_pad) != (M, K):
        a_norm = jnp.pad(a_norm, ((0, m_pad - M), (0, k_pad - K)))
    if k_pad != K:
        b = jnp.pad(b, ((0, k_pad - K), (0, 0)))

    grid = (m_pad // tm, k_pad // tk)

    in_specs = [
        # A_norm: stream (tm, tk) row x reduction tiles.
        pl.BlockSpec((tm, tk), lambda i, k: (i, k)),
        # b: stream (tk, f_mid) tiles along the reduction axis only.
        pl.BlockSpec((tk, f_mid), lambda i, k: (k, 0)),
    ]
    if fuse_weight:
        # W: whole matrix, grid-invariant -> loaded once, stays VMEM-resident.
        in_specs.append(pl.BlockSpec((f_in, f_out), lambda i, k: (0, 0)))
        operands = (a_norm, b, weight)
        kernel = _gcn_fused_kernel
        flops = 2 * m_pad * k_pad * f_mid + 2 * m_pad * f_mid * f_out
        w_bytes = weight.size
    else:
        operands = (a_norm, b)
        kernel = _stream_matmul_kernel
        flops = 2 * m_pad * k_pad * f_mid
        w_bytes = 0

    itemsize = jnp.dtype(x.dtype).itemsize
    cost = pl.CostEstimate(
        flops=flops,
        transcendentals=0,
        bytes_accessed=(a_norm.size + b.size + w_bytes + m_pad * f_out) * itemsize,
    )

    out = pl.pallas_call(
        kernel,
        out_shape=jax.ShapeDtypeStruct((m_pad, f_out), x.dtype),
        grid_spec=pltpu.PrefetchScalarGridSpec(
            num_scalar_prefetch=0,
            grid=grid,
            in_specs=in_specs,
            out_specs=pl.BlockSpec((tm, f_out), lambda i, k: (i, 0)),
            scratch_shapes=[pltpu.VMEM((tm, f_mid), jnp.float32)],
        ),
        compiler_params=pltpu.CompilerParams(
            dimension_semantics=("parallel", "arbitrary"),
            vmem_limit_bytes=32 * 1024 * 1024,  # safe headroom on v5e/v6e/v7x
        ),
        cost_estimate=cost,
    )(*operands)

    return out[:M]


def xavier_uniform(key, shape, dtype=jnp.float32):
    fan_in, fan_out = shape
    bound = (6.0 / (fan_in + fan_out)) ** 0.5
    return jax.random.uniform(key, shape, dtype, minval=-bound, maxval=bound)


def _make_inputs(key, n, f_in):
    k_x, k_a = jax.random.split(key)
    x = jax.random.normal(k_x, (n, f_in), dtype=jnp.float32)
    adj = (jax.random.uniform(k_a, (n, n)) < 0.1).astype(jnp.float32)
    adj = adj + jnp.eye(n, dtype=jnp.float32)            # self loops
    a_norm = adj / jnp.sum(adj, axis=1, keepdims=True)   # D^-1 A normalization
    return x, a_norm


if __name__ == "__main__":
    key = jax.random.PRNGKey(0)
    k1, k2, k3, k4 = jax.random.split(key, 4)

    ok = True

    # Case 1: F_in <= F_out  -> fully fused (A @ x) @ W path, aligned shapes.
    N1, FI1, FO1 = 512, 64, 128
    w1 = xavier_uniform(k1, (FI1, FO1))
    x1, a1 = _make_inputs(k2, N1, FI1)
    out1 = gcn_layer_forward(x1, a1, w1)
    jax.block_until_ready(out1)
    ref1 = a1 @ (x1 @ w1)
    ok &= out1.shape == (N1, FO1)
    ok &= bool(jnp.allclose(out1, ref1, atol=1e-4, rtol=1e-4))

    # Case 2: F_in > F_out, non-128-aligned N -> pre-projection path + padding.
    N2, FI2, FO2 = 500, 96, 48
    w2 = xavier_uniform(k3, (FI2, FO2))
    x2, a2 = _make_inputs(k4, N2, FI2)
    out2 = gcn_layer_forward(x2, a2, w2)
    jax.block_until_ready(out2)
    ref2 = a2 @ (x2 @ w2)
    ok &= out2.shape == (N2, FO2)
    ok &= bool(jnp.allclose(out2, ref2, atol=1e-4, rtol=1e-4))

    assert ok
    print("KERNEL_OK")
</pallas_src>

<mosaic_0001>
module attributes {stable_mosaic.version = 11 : i64} {
  func.func @_gcn_fused_kernel(%arg0: i32, %arg1: i32, %arg2: memref<256x512xf32, #tpu.memory_space<vmem>>, %arg3: memref<512x64xf32, #tpu.memory_space<vmem>>, %arg4: memref<64x128xf32, #tpu.memory_space<vmem>>, %arg5: memref<256x128xf32, #tpu.memory_space<vmem>>, %arg6: memref<256x64xf32, #tpu.memory_space<vmem>>) attributes {dimension_semantics = [#tpu.dimension_semantics<parallel>, #tpu.dimension_semantics<arbitrary>], iteration_bounds = array<i64: 2, 1>, scalar_prefetch = 0 : i64, scratch_operands = 1 : i64, tpu.core_type = #tpu.core_type<tc>, window_params = [{transform_indices = @transform_0, window_bounds = array<i64: 256, 512>}, {transform_indices = @transform_1, window_bounds = array<i64: 512, 64>}, {pipeline_mode = #tpu.pipeline_mode<synchronous>, transform_indices = @transform_2, window_bounds = array<i64: 64, 128>}, {transform_indices = @transform_3, window_bounds = array<i64: 256, 128>}]} {
    %c0_i32 = arith.constant 0 : i32
    %0 = arith.cmpi eq, %arg1, %c0_i32 : i32
    %1 = arith.extui %0 : i1 to i32
    %c0_i32_0 = arith.constant 0 : i32
    %2 = arith.cmpi ne, %1, %c0_i32_0 : i32
    scf.if %2 {
      %cst_10 = arith.constant 0.000000e+00 : f32
      %12 = vector.broadcast %cst_10 : f32 to vector<256x64xf32>
      %c0_11 = arith.constant 0 : index
      %c0_12 = arith.constant 0 : index
      %13 = vector.load %arg6[%c0_11, %c0_12] : memref<256x64xf32, #tpu.memory_space<vmem>>, vector<256x64xf32>
      tpu.vector_store %arg6[%c0_11, %c0_12], %12 {strides = array<i32>} : memref<256x64xf32, #tpu.memory_space<vmem>>, vector<256x64xf32>,
    } else {
    }
    %c0 = arith.constant 0 : index
    %c0_1 = arith.constant 0 : index
    %3 = vector.load %arg6[%c0, %c0_1] : memref<256x64xf32, #tpu.memory_space<vmem>>, vector<256x64xf32>
    %c0_2 = arith.constant 0 : index
    %c0_3 = arith.constant 0 : index
    %4 = vector.load %arg2[%c0_2, %c0_3] : memref<256x512xf32, #tpu.memory_space<vmem>>, vector<256x512xf32>
    %c0_4 = arith.constant 0 : index
    %c0_5 = arith.constant 0 : index
    %5 = vector.load %arg3[%c0_4, %c0_5] : memref<512x64xf32, #tpu.memory_space<vmem>>, vector<512x64xf32>
    %cst = arith.constant dense<0.000000e+00> : vector<256x64xf32>
    %6 = tpu.matmul %4, %5, %cst {dimension_numbers = #tpu.dot_dimension_numbers<[1], [0], [0], [1], [0, 0, 1, 1], [], []>} : vector<256x512xf32>, vector<512x64xf32>, vector<256x64xf32> -> vector<256x64xf32>
    %7 = arith.addf %3, %6 : vector<256x64xf32>
    %c0_6 = arith.constant 0 : index
    %c0_7 = arith.constant 0 : index
    %8 = vector.load %arg6[%c0_6, %c0_7] : memref<256x64xf32, #tpu.memory_space<vmem>>, vector<256x64xf32>
    tpu.vector_store %arg6[%c0_6, %c0_7], %7 {strides = array<i32>} : memref<256x64xf32, #tpu.memory_space<vmem>>, vector<256x64xf32>,
    %c0_i32_8 = arith.constant 0 : i32
    %9 = arith.cmpi eq, %arg1, %c0_i32_8 : i32
    %10 = arith.extui %9 : i1 to i32
    %c0_i32_9 = arith.constant 0 : i32
    %11 = arith.cmpi ne, %10, %c0_i32_9 : i32
    scf.if %11 {
      %c0_10 = arith.constant 0 : index
      %c0_11 = arith.constant 0 : index
      %12 = vector.load %arg6[%c0_10, %c0_11] : memref<256x64xf32, #tpu.memory_space<vmem>>, vector<256x64xf32>
      %c0_12 = arith.constant 0 : index
      %c0_13 = arith.constant 0 : index
      %13 = vector.load %arg4[%c0_12, %c0_13] : memref<64x128xf32, #tpu.memory_space<vmem>>, vector<64x128xf32>
      %cst_14 = arith.constant dense<0.000000e+00> : vector<256x128xf32>
      %14 = tpu.matmul %12, %13, %cst_14 {dimension_numbers = #tpu.dot_dimension_numbers<[1], [0], [0], [1], [0, 0, 1, 1], [], []>} : vector<256x64xf32>, vector<64x128xf32>, vector<256x128xf32> -> vector<256x128xf32>
      %c0_15 = arith.constant 0 : index
      %c0_16 = arith.constant 0 : index
      %15 = vector.load %arg5[%c0_15, %c0_16] : memref<256x128xf32, #tpu.memory_space<vmem>>, vector<256x128xf32>
      tpu.vector_store %arg5[%c0_15, %c0_16], %14 {strides = array<i32>} : memref<256x128xf32, #tpu.memory_space<vmem>>, vector<256x128xf32>,
    } else {
    }
    return
  }
  func.func @transform_0(%arg0: i32, %arg1: i32) -> (i32, i32) {
    %c0_i32 = arith.constant 0 : i32
    return %arg0, %arg1 : i32, i32
  }
  func.func @transform_1(%arg0: i32, %arg1: i32) -> (i32, i32) {
    %c0_i32 = arith.constant 0 : i32
    %c0_i32_0 = arith.constant 0 : i32
    return %arg1, %c0_i32 : i32, i32
  }
  func.func @transform_2(%arg0: i32, %arg1: i32) -> (i32, i32) {
    %c0_i32 = arith.constant 0 : i32
    %c0_i32_0 = arith.constant 0 : i32
    %c0_i32_1 = arith.constant 0 : i32
    return %c0_i32, %c0_i32_0 : i32, i32
  }
  func.func @transform_3(%arg0: i32, %arg1: i32) -> (i32, i32) {
    %c0_i32 = arith.constant 0 : i32
    %c0_i32_0 = arith.constant 0 : i32
    return %arg0, %c0_i32 : i32, i32
  }
}

</mosaic_0001>

<bundles_post_ra>
// kernel: gcn_layer_forward.1
= control target key start
LH: loop header
LB: loop body
LE: loop exit
PB: predicated region body
PF: predicated region fallthrough
CT: control target
= control target key end

     0   :  { %8 = vsyncpa [#allocation4], 0  ;;  %s2418_s0 = inlined_call_operand.hbm [shape: f32[512,512], index: 0, kind: input, shape index: {}]   ;;  %s2419_s1 = inlined_call_operand.vmem [shape: f32[512,64], index: 1, kind: input, shape index: {}]   ;;  %s2420_s2 = inlined_call_operand.vmem [shape: f32[64,128], index: 2, kind: input, shape index: {}]   ;;  %s2421_s3 = inlined_call_operand.hbm [shape: f32[512,128], index: 3, kind: output, shape index: {}]  }
   0x1   :  { %10 = vsyncpa [#allocation4 + $0x1], 0 }
   0x2   :  { %11 = vsyncpa [#allocation5], 0 }
   0x3   :  { %13 = vsyncpa [#allocation5 + $0x1], 0  ;;  %s1716_s12 = smov 0   ;;  %s1718_s13 = smov 0  }
   0x4   :  { %s1720_s14 = smov 0   ;;  %s1722_s15 = smov 0  }
   0x5   :  { %s1724_s16 = smov 0   ;;  %s1726_s17 = smov 0  }
   0x6 LB: > { %s1410_s18 = sadd.s32 4294967295, %s1689_s17   ;;  %s1411_s19 = sadd.s32 4294967294, %s1689_s17   ;;  %s1689_s17 = sphi %s1726_s17, %s19_s17   ;;  %s1685_s16 = sphi %s1724_s16, %s2430_s16   ;;  %s1681_s15 = sphi %s1722_s15, %s2429_s15   ;;  %s1677_s14 = sphi %s1720_s14, %s2428_s14   ;;  %s1673_s13 = sphi %s1718_s13, %s2427_s13   ;;  %s1669_s12 = sphi %s1716_s12, %s2426_s12  }
   0x7   : > { %s31_s20 = sadd.s32 1, %s1685_s16  ;;  %s40_s21 = sadd.s32 1, %s1677_s14 }
   0x8   : > { %p33_p0 = scmp.ge.s32.totalorder %s31_s20, 2  ;;  %p47_p1 = scmp.ne.s32.totalorder %s1677_s14, %s1673_s13 }
   0x9   : > { %p48_p2 = scmp.eq.s32.totalorder %s1689_s17, 0  ;;  %p53_p3 = scmp.ne.s32.totalorder %s1673_s13, %s1669_s12 }
   0xa   : > { %s2432_s20 = smov (%p33_p0, %s31_s20), 0  ;;  %p54_p5 = scmp.eq.s32.totalorder %s1410_s18, 0 }
   0xb   : > { %p1757_p4 = por %p48_p2, %p47_p1  ;;  %s35_s23 = ssub.s32 %s1685_s16, %s2432_s20 }
   0xc   : > { %p124_p6 = scmp.eq.s32.totalorder %s1410_s18, 1  ;;  %p38_p7 = scmp.eq.s32.totalorder %s35_s23, 0 }
   0xd   : > { %p1763_p8 = por %p54_p5, %p53_p3  ;;  %p130_p10 = scmp.eq.s32.totalorder %s1411_s19, 1 }
   0xe   : > { %p1767_p9 = por %p124_p6, %p47_p1  ;;  %p1414_p12 = scmp.ge.s32.totalorder %s1689_s17, 2 }
   0xf   : > { %s1772_s26 = scalar_select %p38_p7, %s1677_s14, %s40_s21  }
  0x10   : > { %p1774_p11 = por %p130_p10, %p53_p3  ;;  %p1522_p13 = scmp.lt.s32.totalorder %s1689_s17, 2 }
  0x11   : > { %s162_s28 = sand.u32 1, %s1677_s14   ;;  %s1460_s30 = sshll.u32 %s1685_s16, 10 }
  0x12   : > { %s1415_s29 = sshll.u32 %s162_s28, 10  ;;  %s174_s6 = scalar_lea.hbm %s2418_s0, %s1460_s30 }
  0x13   : > { %s166_s7 = scalar_lea.vmem [#allocation3], %s1415_s29  ;;  %s175_s9 = sshll.u32 %s174_s6, 4  ;;  %s176_s9 = int_to_ptr.hbm [resolvable:$true] %s175_s9 }
  0x14   : > { %s177_s8 = sshll.u32 %s166_s7, 4  ;;  %p1515_p0 = pnand %p1522_p13, %p1757_p4  ;;  %s178_s8 = int_to_ptr.vmem [resolvable:$true] %s177_s8 }
  0x15   : > { %p1419_p1 = scmp.ge.s32.totalorder %s1689_s17, 1  ;;  %s163_s10 = scalar_lea.sflag [#allocation4], %s162_s28 }
  0x16   : > { %s1691_s11 = smov 512   ;;  %s1692_s18 = smov 32  }
  0x17   : > { %1517 = dma.hbm_to_vmem [thread:$0]  (!%p1515_p0), %s176_s9, 16384, %s178_s8, %s163_s10, %s1691_s11, %s1691_s11, %s1692_s18  }
  0x18   : > { %p185_p2 = scmp.lt.s32.totalorder %s1689_s17, 3 }
  0x1a   : > { %p186_p3 = pnand %p1419_p1, %p185_p2 }
  0x1b   : > { %s1790_s19 = sand.u32 (!%p186_p3), 1, %s1673_s13  }
  0x1c   : > { %189 = sbr.rel (%p186_p3) target bundleno = 654 (0x28e), region = 32  ;;  %s1420_s21 = sshll.u32 (!%p186_p3), %s1790_s19, 10 }
  0x1d   : > { %s192_s23 = scalar_lea.sflag (!%p186_p3), [#allocation4], %s1790_s19  ;;  %s1794_s29 = scalar_lea.vmem (!%p186_p3), [#allocation3], %s1420_s21 }
  0x21   : > { %1660 = dma.done.wait (%p1763_p8), %s192_s23, 16384  }
  0x22   : > { %1662 = vsyncadd (%p1763_p8), %s192_s23, 4294950912  ;;  %v445_v0 = vld [vmem:[%s2419_s1 + $0x78] sm:$0xff]  ;;  %v444_v1 = vld [vmem:[%s2419_s1 + $0x70] sm:$0xff]  ;;  %vm237_vm0 = vcmask 523264   ;;  %s1461_s10 = sshll.u32 %s1681_s15, 8  ;;  %s1296_s28 = scalar_lea.sflag [#allocation5], %s1790_s19 }
  0x23   : > { %1462 = vmatpush.msra.mxu1 %v445_v0  ;;  %1463 = vmatpush.msra.mxu2 %v445_v0  ;;  %v443_v2 = vld [vmem:[%s2419_s1 + $0x68] sm:$0xff]  ;;  %v442_v3 = vld [vmem:[%s2419_s1 + $0x60] sm:$0xff]  ;;  %v441_v4 = vld [vmem:[%s2419_s1 + $0x58] sm:$0xff]  ;;  %s1307_s21 = scalar_lea.hbm %s2421_s3, %s1461_s10  ;;  %s1627_s6 = scalar_lea.hbm %s2421_s3, 512 }
  0x24   : > { %1464 = vmatpush.msra.mxu3 %v445_v0  ;;  %494 = vmatpush.msra.mxu0 %v445_v0  ;;  %v440_v5 = vld [vmem:[%s2419_s1 + $0x50] sm:$0xff]  ;;  %v439_v6 = vld [vmem:[%s2419_s1 + $0x48] sm:$0xff]  ;;  %v438_v7 = vld [vmem:[%s2419_s1 + $0x40] sm:$0xff]  ;;  %s1310_s22 = sshll.u32 %s1307_s21, 4  ;;  %s1311_s22 = int_to_ptr.hbm [resolvable:$true] %s1310_s22 }
  0x25   : > { %1465 = vmatpush.msra.mxu1 %v444_v1  ;;  %1466 = vmatpush.msra.mxu2 %v444_v1  ;;  %v437_v8 = vld [vmem:[%s2419_s1 + $0x38] sm:$0xff]  ;;  %v436_v9 = vld [vmem:[%s2419_s1 + $0x30] sm:$0xff]  ;;  %v435_v10 = vld [vmem:[%s2419_s1 + $0x28] sm:$0xff]  ;;  %s1621_s30 = sshra.s32 %s1311_s22, 4  ;;  %s1622_s30 = int_to_ptr.hbm [resolvable:$true] %s1621_s30 }
  0x26   : > { %1467 = vmatpush.msra.mxu3 %v444_v1  ;;  %495 = vmatpush.msra.mxu0 %v444_v1  ;;  %v434_v11 = vld [vmem:[%s2419_s1 + $0x20] sm:$0xff]  ;;  %v433_v12 = vld [vmem:[%s2419_s1 + $0x18] sm:$0xff]  ;;  %v432_v13 = vld [vmem:[%s2419_s1 + $0x10] sm:$0xff]  ;;  %s1623_s4 = scalar_lea.hbm %s1622_s30, 256  ;;  %p1628_p7 = scmp.lt.s32.totalorder %s1622_s30, %s2421_s3 }
  0x27   : > { %1468 = vmatpush.msra.mxu1 %v443_v2  ;;  %1469 = vmatpush.msra.mxu2 %v443_v2  ;;  %v431_v14 = vld [vmem:[%s2419_s1 + $0x8] sm:$0xff]  ;;  %v430_v15 = vld [vmem:[%s2419_s1] sm:$0xff]  ;;  %v477_v18 = vld [vmem:[%s2419_s1 + $0x178] sm:$0xff]  ;;  %p1624_p4 = scmp.ne.s32.totalorder %s1622_s30, %s1623_s4  ;;  %p1629_p8 = scmp.lt.s32.totalorder %s1627_s6, %s1623_s4 }
  0x28   : > { %1470 = vmatpush.msra.mxu3 %v443_v2  ;;  %496 = vmatpush.msra.mxu0 %v443_v2  ;;  %v334_v16 = vld [vmem:[%s1794_s29 + $0x100] sm:$0xff]  ;;  %v461_v20 = vld [vmem:[%s2419_s1 + $0xf8] sm:$0xff]  ;;  %v476_v22 = vld [vmem:[%s2419_s1 + $0x170] sm:$0xff] }
  0x29   : > { %1471 = vmatpush.msra.mxu1 %v442_v3  ;;  %1472 = vmatpush.msra.mxu2 %v442_v3  ;;  %v366_v17 = vld [vmem:[%s1794_s29 + $0x200] sm:$0xff]  ;;  %v493_v21 = vld [vmem:[%s2419_s1 + $0x1f8] sm:$0xff]  ;;  %v460_v23 = vld [vmem:[%s2419_s1 + $0xf0] sm:$0xff]  ;;  %p1625_p5 = pnand %p1624_p4, %p1767_p9  ;;  %p1630_p10 = por %p1629_p8, %p1628_p7 }
  0x2a   : > { %1473 = vmatpush.msra.mxu3 %v442_v3  ;;  %497 = vmatpush.msra.mxu0 %v442_v3  ;;  %v398_v19 = vld [vmem:[%s1794_s29 + $0x300] sm:$0xff]  ;;  %v492_v24 = vld [vmem:[%s2419_s1 + $0x1f0] sm:$0xff]  ;;  %v475_v25 = vld [vmem:[%s2419_s1 + $0x168] sm:$0xff] }
  0x2b   : > { %1474 = vmatpush.msra.mxu1 %v441_v4  ;;  %1475 = vmatpush.msra.mxu2 %v441_v4  ;;  %v459_v26 = vld [vmem:[%s2419_s1 + $0xe8] sm:$0xff]  ;;  %v474_v28 = vld [vmem:[%s2419_s1 + $0x160] sm:$0xff]  ;;  %v473_v34 = vld [vmem:[%s2419_s1 + $0x158] sm:$0xff]  ;;  %p1626_p6 = pneg %p1625_p5 }
  0x2c   : > { %1476 = vmatpush.msra.mxu3 %v441_v4  ;;  %498 = vmatpush.msra.mxu0 %v441_v4  ;;  %v491_v27 = vld [vmem:[%s2419_s1 + $0x1e8] sm:$0xff]  ;;  %v338_v29 = vld [vmem:[%s1794_s29 + $0x120] sm:$0xff]  ;;  %v489_v35 = vld [vmem:[%s2419_s1 + $0x1d8] sm:$0xff] }
  0x2d   : > { %1477 = vmatpush.msra.mxu1 %v440_v5  ;;  %1478 = vmatpush.msra.mxu2 %v440_v5  ;;  %v370_v30 = vld [vmem:[%s1794_s29 + $0x220] sm:$0xff]  ;;  %v457_v36 = vld [vmem:[%s2419_s1 + $0xd8] sm:$0xff]  ;;  %v472_v37 = vld [vmem:[%s2419_s1 + $0x150] sm:$0xff]  ;;  %p1631_p13 = pnand %p1630_p10, %p1626_p6 }
  0x2e   : > { %1479 = vmatpush.msra.mxu3 %v440_v5  ;;  %499 = vmatpush.msra.mxu0 %v440_v5  ;;  %v490_v31 = vld [vmem:[%s2419_s1 + $0x1e0] sm:$0xff]  ;;  %v488_v38 = vld [vmem:[%s2419_s1 + $0x1d0] sm:$0xff]  ;;  %v471_v40 = vld [vmem:[%s2419_s1 + $0x148] sm:$0xff] }
  0x2f   : > { %1480 = vmatpush.msra.mxu1 %v439_v6  ;;  %1481 = vmatpush.msra.mxu2 %v439_v6  ;;  %v458_v32 = vld [vmem:[%s2419_s1 + $0xe0] sm:$0xff]  ;;  %v456_v39 = vld [vmem:[%s2419_s1 + $0xd0] sm:$0xff]  ;;  %v487_v41 = vld [vmem:[%s2419_s1 + $0x1c8] sm:$0xff] }
  0x30   : > { %1482 = vmatpush.msra.mxu3 %v439_v6  ;;  %500 = vmatpush.msra.mxu0 %v439_v6  ;;  %v402_v33 = vld [vmem:[%s1794_s29 + $0x320] sm:$0xff]  ;;  %v455_v42 = vld [vmem:[%s2419_s1 + $0xc8] sm:$0xff]  ;;  %v469_v49 = vld [vmem:[%s2419_s1 + $0x138] sm:$0xff] }
  0x31   : > { %1483 = vmatpush.msra.mxu1 %v438_v7  ;;  %1484 = vmatpush.msra.mxu2 %v438_v7  ;;  %v342_v43 = vld [vmem:[%s1794_s29 + $0x140] sm:$0xff]  ;;  %v485_v50 = vld [vmem:[%s2419_s1 + $0x1b8] sm:$0xff]  ;;  %v468_v52 = vld [vmem:[%s2419_s1 + $0x130] sm:$0xff] }
  0x32   : > { %1485 = vmatpush.msra.mxu3 %v438_v7  ;;  %501 = vmatpush.msra.mxu0 %v438_v7  ;;  %v374_v44 = vld [vmem:[%s1794_s29 + $0x240] sm:$0xff]  ;;  %v453_v51 = vld [vmem:[%s2419_s1 + $0xb8] sm:$0xff]  ;;  %v484_v53 = vld [vmem:[%s2419_s1 + $0x1b0] sm:$0xff] }
  0x33   : > { %1486 = vmatpush.msra.mxu1 %v437_v8  ;;  %1487 = vmatpush.msra.mxu2 %v437_v8  ;;  %v470_v45 = vld [vmem:[%s2419_s1 + $0x140] sm:$0xff]  ;;  %v452_v54 = vld [vmem:[%s2419_s1 + $0xb0] sm:$0xff]  ;;  %v467_v55 = vld [vmem:[%s2419_s1 + $0x128] sm:$0xff] }
  0x34   : > { %1488 = vmatpush.msra.mxu3 %v437_v8  ;;  %502 = vmatpush.msra.mxu0 %v437_v8  ;;  %v486_v46 = vld [vmem:[%s2419_s1 + $0x1c0] sm:$0xff]  ;;  %v483_v56 = vld [vmem:[%s2419_s1 + $0x1a8] sm:$0xff]  ;;  %v465_v0 = vld [vmem:[%s2419_s1 + $0x118] sm:$0xff] }
  0x35   : > { %1489 = vmatpush.msra.mxu1 %v436_v9  ;;  %1490 = vmatpush.msra.mxu2 %v436_v9  ;;  %v406_v47 = vld [vmem:[%s1794_s29 + $0x340] sm:$0xff]  ;;  %v451_v59 = vld [vmem:[%s2419_s1 + $0xa8] sm:$0xff]  ;;  %v481_v1 = vld [vmem:[%s2419_s1 + $0x198] sm:$0xff] }
  0x36   : > { %1491 = vmatpush.msra.mxu3 %v436_v9  ;;  %503 = vmatpush.msra.mxu0 %v436_v9  ;;  %v454_v48 = vld [vmem:[%s2419_s1 + $0xc0] sm:$0xff]  ;;  %v449_v2 = vld [vmem:[%s2419_s1 + $0x98] sm:$0xff]  ;;  %v464_v3 = vld [vmem:[%s2419_s1 + $0x110] sm:$0xff] }
  0x37   : > { %1492 = vmatpush.msra.mxu1 %v435_v10  ;;  %1493 = vmatpush.msra.mxu2 %v435_v10  ;;  %v346_v57 = vld [vmem:[%s1794_s29 + $0x160] sm:$0xff]  ;;  %v480_v4 = vld [vmem:[%s2419_s1 + $0x190] sm:$0xff]  ;;  %v463_v8 = vld [vmem:[%s2419_s1 + $0x108] sm:$0xff] }
  0x38   : > { %1494 = vmatpush.msra.mxu3 %v435_v10  ;;  %504 = vmatpush.msra.mxu0 %v435_v10  ;;  %v378_v58 = vld [vmem:[%s1794_s29 + $0x260] sm:$0xff]  ;;  %v448_v5 = vld [vmem:[%s2419_s1 + $0x90] sm:$0xff]  ;;  %v479_v9 = vld [vmem:[%s2419_s1 + $0x188] sm:$0xff] }
  0x39   : > { %1495 = vmatpush.msra.mxu1 %v434_v11  ;;  %1496 = vmatpush.msra.mxu2 %v434_v11  ;;  %v466_v60 = vld [vmem:[%s2419_s1 + $0x120] sm:$0xff] }
  0x3a   : > { %1497 = vmatpush.msra.mxu3 %v434_v11  ;;  %505 = vmatpush.msra.mxu0 %v434_v11  ;;  %v410_v61 = vld [vmem:[%s1794_s29 + $0x360] sm:$0xff]  ;;  %v447_v11 = vld [vmem:[%s2419_s1 + $0x88] sm:$0xff] }
  0x3b   : > { %1498 = vmatpush.msra.mxu1 %v433_v12  ;;  %1499 = vmatpush.msra.mxu2 %v433_v12  ;;  %v482_v62 = vld [vmem:[%s2419_s1 + $0x1a0] sm:$0xff] }
  0x3c   : > { %1500 = vmatpush.msra.mxu3 %v433_v12  ;;  %506 = vmatpush.msra.mxu0 %v433_v12  ;;  %v450_v63 = vld [vmem:[%s2419_s1 + $0xa0] sm:$0xff] }
  0x3d   : > { %1501 = vmatpush.msra.mxu1 %v432_v13  ;;  %1502 = vmatpush.msra.mxu2 %v432_v13  ;;  %v350_v6 = vld [vmem:[%s1794_s29 + $0x180] sm:$0xff] }
  0x3e   : > { %1503 = vmatpush.msra.mxu3 %v432_v13  ;;  %507 = vmatpush.msra.mxu0 %v432_v13  ;;  %v382_v7 = vld [vmem:[%s1794_s29 + $0x280] sm:$0xff] }
  0x3f   : > { %1504 = vmatpush.msra.mxu1 %v431_v14  ;;  %1505 = vmatpush.msra.mxu2 %v431_v14  ;;  %v414_v10 = vld [vmem:[%s1794_s29 + $0x380] sm:$0xff] }
  0x40   : > { %1506 = vmatpush.msra.mxu3 %v431_v14  ;;  %508 = vmatpush.msra.mxu0 %v431_v14  ;;  %v462_v12 = vld [vmem:[%s2419_s1 + $0x100] sm:$0xff] }
  0x41   : > { %1507 = vmatpush.msra.mxu1 %v430_v15  ;;  %1508 = vmatpush.msra.mxu2 %v430_v15  ;;  %v478_v13 = vld [vmem:[%s2419_s1 + $0x180] sm:$0xff] }
  0x42   : > { %534 = vmatmul.f32.vlgmr.msra.gmra.mxu1 %v334_v16  ;;  %558 = vmatmul.f32.vlgmr.msra.gmra.mxu2 %v366_v17  ;;  %v446_v14 = vld [vmem:[%s2419_s1 + $0x80] sm:$0xff] }
  0x43   : > { %720 = vmatpush.msrb.mxu2 %v477_v18  ;;  %1509 = vmatpush.msra.mxu3 %v430_v15  ;;  %v354_v16 = vld [vmem:[%s1794_s29 + $0x1a0] sm:$0xff] }
  0x44   : > { %582 = vmatmul.f32.vlgmr.msra.gmra.mxu3 %v398_v19  ;;  %607 = vmatpush.msrb.mxu1 %v461_v20  ;;  %v386_v17 = vld [vmem:[%s1794_s29 + $0x2a0] sm:$0xff] }
  0x45   : > { %833 = vmatpush.msrb.mxu3 %v493_v21  ;;  %721 = vmatpush.msrb.mxu2 %v476_v22  ;;  %v418_v18 = vld [vmem:[%s1794_s29 + $0x3a0] sm:$0xff] }
  0x46   : > { %608 = vmatpush.msrb.mxu1 %v460_v23  ;;  %509 = vmatpush.msra.mxu0 %v430_v15  ;;  %v302_v15 = vld [vmem:[%s1794_s29] sm:$0xff] }
  0x47   : > { %834 = vmatpush.msrb.mxu3 %v492_v24  ;;  %722 = vmatpush.msrb.mxu2 %v475_v25  ;;  %v306_v19 = vld [vmem:[%s1794_s29 + $0x20] sm:$0xff] }
  0x48   : > { %609 = vmatpush.msrb.mxu1 %v459_v26  ;;  %510 = vmatmul.f32.vlgmr.msra.gmra.mxu0 %v302_v15  ;;  %v358_v20 = vld [vmem:[%s1794_s29 + $0x1c0] sm:$0xff] }
  0x49   : > { %835 = vmatpush.msrb.mxu3 %v491_v27  ;;  %723 = vmatpush.msrb.mxu2 %v474_v28  ;;  %v390_v21 = vld [vmem:[%s1794_s29 + $0x2c0] sm:$0xff]  ;;  %v303_v28 = vld [vmem:[%s1794_s29 + $0x8] sm:$0xff] }
  0x4a   : > { %537 = vmatmul.f32.gmra.mxu1 %v338_v29  ;;  %561 = vmatmul.f32.gmra.mxu2 %v370_v30  ;;  %v422_v22 = vld [vmem:[%s1794_s29 + $0x3c0] sm:$0xff]  ;;  %v304_v29 = vld [vmem:[%s1794_s29 + $0x10] sm:$0xff]  ;;  %v305_v30 = vld [vmem:[%s1794_s29 + $0x18] sm:$0xff] }
  0x4b   : > { %836 = vmatpush.msrb.mxu3 %v490_v31  ;;  %610 = vmatpush.msrb.mxu1 %v458_v32  ;;  %v310_v23 = vld [vmem:[%s1794_s29 + $0x40] sm:$0xff]  ;;  %v307_v32 = vld [vmem:[%s1794_s29 + $0x28] sm:$0xff] }
  0x4c   : > { %585 = vmatmul.f32.gmra.mxu3 %v402_v33  ;;  %724 = vmatpush.msrb.mxu2 %v473_v34  ;;  %v362_v24 = vld [vmem:[%s1794_s29 + $0x1e0] sm:$0xff]  ;;  %v308_v33 = vld [vmem:[%s1794_s29 + $0x30] sm:$0xff]  ;;  %v309_v34 = vld [vmem:[%s1794_s29 + $0x38] sm:$0xff] }
  0x4d   : > { %837 = vmatpush.msrb.mxu3 %v489_v35  ;;  %611 = vmatpush.msrb.mxu1 %v457_v36  ;;  %v394_v25 = vld [vmem:[%s1794_s29 + $0x2e0] sm:$0xff]  ;;  %v311_v36 = vld [vmem:[%s1794_s29 + $0x48] sm:$0xff] }
  0x4e   : > { %725 = vmatpush.msrb.mxu2 %v472_v37  ;;  %v426_v26 = vld [vmem:[%s1794_s29 + $0x3e0] sm:$0xff]  ;;  %v312_v37 = vld [vmem:[%s1794_s29 + $0x50] sm:$0xff] }
  0x4f   : > { %838 = vmatpush.msrb.mxu3 %v488_v38  ;;  %612 = vmatpush.msrb.mxu1 %v456_v39  ;;  %v314_v27 = vld [vmem:[%s1794_s29 + $0x60] sm:$0xff]  ;;  %v313_v38 = vld [vmem:[%s1794_s29 + $0x58] sm:$0xff] }
  0x50   : > { %726 = vmatpush.msrb.mxu2 %v471_v40  ;;  %513 = vmatmul.f32.gmra.mxu0 %v306_v19  ;;  %v318_v31 = vld [vmem:[%s1794_s29 + $0x80] sm:$0xff]  ;;  %v315_v40 = vld [vmem:[%s1794_s29 + $0x68] sm:$0xff]  ;;  %v1048_v19 = vld [vmem:[%s2420_s2 + $0x10] sm:$0xff] }
  0x51   : > { %839 = vmatpush.msrb.mxu3 %v487_v41  ;;  %613 = vmatpush.msrb.mxu1 %v455_v42  ;;  %v322_v35 = vld [vmem:[%s1794_s29 + $0xa0] sm:$0xff]  ;;  %v316_v41 = vld [vmem:[%s1794_s29 + $0x70] sm:$0xff]  ;;  %v317_v42 = vld [vmem:[%s1794_s29 + $0x78] sm:$0xff] }
  0x52   : > { %540 = vmatmul.f32.gmra.mxu1 %v342_v43  ;;  %564 = vmatmul.f32.gmra.mxu2 %v374_v44  ;;  %v326_v39 = vld [vmem:[%s1794_s29 + $0xc0] sm:$0xff]  ;;  %v319_v44 = vld [vmem:[%s1794_s29 + $0x88] sm:$0xff] }
  0x53   : > { %727 = vmatpush.msrb.mxu2 %v470_v45  ;;  %840 = vmatpush.msrb.mxu3 %v486_v46  ;;  %v330_v43 = vld [vmem:[%s1794_s29 + $0xe0] sm:$0xff]  ;;  %v320_v45 = vld [vmem:[%s1794_s29 + $0x90] sm:$0xff]  ;;  %v321_v46 = vld [vmem:[%s1794_s29 + $0x98] sm:$0xff] }
  0x54   : > { %588 = vmatmul.f32.gmra.mxu3 %v406_v47  ;;  %614 = vmatpush.msrb.mxu1 %v454_v48  ;;  %v323_v47 = vld [vmem:[%s1794_s29 + $0xa8] sm:$0xff]  ;;  %v324_v48 = vld [vmem:[%s1794_s29 + $0xb0] sm:$0xff] }
  0x55   : > { %728 = vmatpush.msrb.mxu2 %v469_v49  ;;  %841 = vmatpush.msrb.mxu3 %v485_v50  ;;  %v325_v49 = vld [vmem:[%s1794_s29 + $0xb8] sm:$0xff]  ;;  %v327_v50 = vld [vmem:[%s1794_s29 + $0xc8] sm:$0xff] }
  0x56   : > { %615 = vmatpush.msrb.mxu1 %v453_v51  ;;  %v328_v51 = vld [vmem:[%s1794_s29 + $0xd0] sm:$0xff] }
  0x57   : > { %729 = vmatpush.msrb.mxu2 %v468_v52  ;;  %842 = vmatpush.msrb.mxu3 %v484_v53  ;;  %v329_v52 = vld [vmem:[%s1794_s29 + $0xd8] sm:$0xff] }
  0x58   : > { %616 = vmatpush.msrb.mxu1 %v452_v54  ;;  %516 = vmatmul.f32.gmra.mxu0 %v310_v23  ;;  %v1053_v53 = vld [vmem:[%s2420_s2 + $0x38] sm:$0xff]  ;;  %v331_v54 = vld [vmem:[%s1794_s29 + $0xe8] sm:$0xff] }
  0x59   : > { %730 = vmatpush.msrb.mxu2 %v467_v55  ;;  %843 = vmatpush.msrb.mxu3 %v483_v56  ;;  %v332_v55 = vld [vmem:[%s1794_s29 + $0xf0] sm:$0xff]  ;;  %v333_v56 = vld [vmem:[%s1794_s29 + $0xf8] sm:$0xff]  ;;  %v351_v23 = vld [vmem:[%s1794_s29 + $0x188] sm:$0xff] }
  0x5a   : > { %543 = vmatmul.f32.gmra.mxu1 %v346_v57  ;;  %567 = vmatmul.f32.gmra.mxu2 %v378_v58  ;;  %v1052_v57 = vld [vmem:[%s2420_s2 + $0x30] sm:$0xff] }
  0x5b   : > { %617 = vmatpush.msrb.mxu1 %v451_v59  ;;  %731 = vmatpush.msrb.mxu2 %v466_v60  ;;  %v335_v59 = vld [vmem:[%s1794_s29 + $0x108] sm:$0xff]  ;;  %v336_v60 = vld [vmem:[%s1794_s29 + $0x110] sm:$0xff] }
  0x5c   : > { %591 = vmatmul.f32.gmra.mxu3 %v410_v61  ;;  %1158 = vmatpush.msrb.mxu0 %v1053_v53  ;;  %v337_v61 = vld [vmem:[%s1794_s29 + $0x118] sm:$0xff]  ;;  %v368_v53 = vld [vmem:[%s1794_s29 + $0x210] sm:$0xff] }
  0x5d   : > { %844 = vmatpush.msrb.mxu3 %v482_v62  ;;  %618 = vmatpush.msrb.mxu1 %v450_v63  ;;  %v1051_v62 = vld [vmem:[%s2420_s2 + $0x28] sm:$0xff] }
  0x5e   : > { %732 = vmatpush.msrb.mxu2 %v465_v0  ;;  %1159 = vmatpush.msrb.mxu0 %v1052_v57 }
  0x5f   : > { %845 = vmatpush.msrb.mxu3 %v481_v1  ;;  %619 = vmatpush.msrb.mxu1 %v449_v2  ;;  %v339_v2 = vld [vmem:[%s1794_s29 + $0x128] sm:$0xff] }
  0x60   : > { %733 = vmatpush.msrb.mxu2 %v464_v3  ;;  %519 = vmatmul.f32.gmra.mxu0 %v314_v27  ;;  %v340_v3 = vld [vmem:[%s1794_s29 + $0x130] sm:$0xff]  ;;  %v1047_v27 = vld [vmem:[%s2420_s2 + $0x8] sm:$0xff] }
  0x61   : > { %846 = vmatpush.msrb.mxu3 %v480_v4  ;;  %620 = vmatpush.msrb.mxu1 %v448_v5  ;;  %v341_v4 = vld [vmem:[%s1794_s29 + $0x138] sm:$0xff]  ;;  %v1050_v5 = vld [vmem:[%s2420_s2 + $0x20] sm:$0xff] }
  0x62   : > { %546 = vmatmul.f32.gmra.mxu1 %v350_v6  ;;  %570 = vmatmul.f32.gmra.mxu2 %v382_v7 }
  0x63   : > { %734 = vmatpush.msrb.mxu2 %v463_v8  ;;  %847 = vmatpush.msrb.mxu3 %v479_v9  ;;  %v343_v9 = vld [vmem:[%s1794_s29 + $0x148] sm:$0xff] }
  0x64   : > { %594 = vmatmul.f32.gmra.mxu3 %v414_v10  ;;  %621 = vmatpush.msrb.mxu1 %v447_v11  ;;  %v344_v10 = vld [vmem:[%s1794_s29 + $0x150] sm:$0xff]  ;;  %v345_v11 = vld [vmem:[%s1794_s29 + $0x158] sm:$0xff] }
  0x65   : > { %735 = vmatpush.msrb.mxu2 %v462_v12  ;;  %848 = vmatpush.msrb.mxu3 %v478_v13  ;;  %v1049_v12 = vld [vmem:[%s2420_s2 + $0x18] sm:$0xff] }
  0x66   : > { %622 = vmatpush.msrb.mxu1 %v446_v14  ;;  %1160 = vmatpush.msrb.mxu0 %v1051_v62 }
  0x68   : > { %522 = vmatmul.f32.gmra.mxu0 %v318_v31  ;;  %v355_v31 = vld [vmem:[%s1794_s29 + $0x1a8] sm:$0xff] }
  0x69   : > { %1161 = vmatpush.msrb.mxu0 %v1050_v5  ;;  %v373_v5 = vld [vmem:[%s1794_s29 + $0x238] sm:$0xff] }
  0x6a   : > { %549 = vmatmul.f32.gmra.mxu1 %v354_v16  ;;  %573 = vmatmul.f32.gmra.mxu2 %v386_v17  ;;  %v347_v16 = vld [vmem:[%s1794_s29 + $0x168] sm:$0xff]  ;;  %v348_v17 = vld [vmem:[%s1794_s29 + $0x170] sm:$0xff] }
  0x6b   : > { %1162 = vmatpush.msrb.mxu0 %v1049_v12 }
  0x6c   : > { %597 = vmatmul.f32.gmra.mxu3 %v418_v18  ;;  %v349_v18 = vld [vmem:[%s1794_s29 + $0x178] sm:$0xff] }
  0x6d   : > { %1163 = vmatpush.msrb.mxu0 %v1048_v19 }
  0x6f   : > { %1164 = vmatpush.msrb.mxu0 %v1047_v27 }
  0x70   : > { %525 = vmatmul.f32.gmra.mxu0 %v322_v35 }
  0x72   : > { %552 = vmatmul.f32.gmra.mxu1 %v358_v20  ;;  %576 = vmatmul.f32.gmra.mxu2 %v390_v21 }
  0x74   : > { %600 = vmatmul.f32.gmra.mxu3 %v422_v22 }
  0x78   : > { %528 = vmatmul.f32.gmra.mxu0 %v326_v39  ;;  %v360_v39 = vld [vmem:[%s1794_s29 + $0x1d0] sm:$0xff] }
  0x7a   : > { %555 = vmatmul.f32.gmra.mxu1 %v362_v24  ;;  %579 = vmatmul.f32.gmra.mxu2 %v394_v25  ;;  %v352_v24 = vld [vmem:[%s1794_s29 + $0x190] sm:$0xff]  ;;  %v353_v25 = vld [vmem:[%s1794_s29 + $0x198] sm:$0xff] }
  0x7c   : > { %603 = vmatmul.f32.gmra.mxu3 %v426_v26  ;;  %v1693_v26 = vmov 0.0  }
  0x7d   : > { %238 = vst.msk [vmem:[#allocation2] sm:$0xff] %vm237_vm0, %v1693_v26 }
  0x7e   : > { %239 = vst.msk [vmem:[#allocation2 + $0x8] sm:$0xff] %vm237_vm0, %v1693_v26 }
  0x7f   : > { %240 = vst.msk [vmem:[#allocation2 + $0x10] sm:$0xff] %vm237_vm0, %v1693_v26 }
  0x80   : > { %531 = vmatmul.f32.gmra.mxu0 %v330_v43  ;;  %241 = vst.msk [vmem:[#allocation2 + $0x18] sm:$0xff] %vm237_vm0, %v1693_v26 }
  0x81   : > { %242 = vst.msk [vmem:[#allocation2 + $0x20] sm:$0xff] %vm237_vm0, %v1693_v26 }
  0x82   : > { %623 = vmatmul.f32.vlgmr.msrb.gmra.mxu1 %v303_v28  ;;  %736 = vmatmul.f32.vlgmr.msrb.gmra.mxu2 %v304_v29  ;;  %243 = vst.msk [vmem:[#allocation2 + $0x28] sm:$0xff] %vm237_vm0, %v1693_v26 }
  0x83   : > { %244 = vst.msk [vmem:[#allocation2 + $0x30] sm:$0xff] %vm237_vm0, %v1693_v26 }
  0x84   : > { %849 = vmatmul.f32.vlgmr.msrb.gmra.mxu3 %v305_v30  ;;  %245 = vst.msk [vmem:[#allocation2 + $0x38] sm:$0xff] %vm237_vm0, %v1693_v26 }
  0x85   : > { %246 = vst.msk [vmem:[#allocation2 + $0x40] sm:$0xff] %vm237_vm0, %v1693_v26 }
  0x86   : > { %247 = vst.msk [vmem:[#allocation2 + $0x48] sm:$0xff] %vm237_vm0, %v1693_v26 }
  0x87   : > { %248 = vst.msk [vmem:[#allocation2 + $0x50] sm:$0xff] %vm237_vm0, %v1693_v26 }
  0x88   : > { %249 = vst.msk [vmem:[#allocation2 + $0x58] sm:$0xff] %vm237_vm0, %v1693_v26 }
  0x89   : > { %250 = vst.msk [vmem:[#allocation2 + $0x60] sm:$0xff] %vm237_vm0, %v1693_v26 }
  0x8a   : > { %626 = vmatmul.f32.gmra.mxu1 %v307_v32  ;;  %739 = vmatmul.f32.gmra.mxu2 %v308_v33  ;;  %v356_v32 = vld [vmem:[%s1794_s29 + $0x1b0] sm:$0xff]  ;;  %v357_v33 = vld [vmem:[%s1794_s29 + $0x1b8] sm:$0xff]  ;;  %251 = vst.msk [vmem:[#allocation2 + $0x68] sm:$0xff] %vm237_vm0, %v1693_v26 }
  0x8b   : > { %252 = vst.msk [vmem:[#allocation2 + $0x70] sm:$0xff] %vm237_vm0, %v1693_v26 }
  0x8c   : > { %852 = vmatmul.f32.gmra.mxu3 %v309_v34  ;;  %v1046_v34 = vld [vmem:[%s2420_s2] sm:$0xff]  ;;  %253 = vst.msk [vmem:[#allocation2 + $0x78] sm:$0xff] %vm237_vm0, %v1693_v26 }
  0x8d   : > { %1165 = vmatpush.msrb.mxu0 %v1046_v34  ;;  %254 = vst.msk [vmem:[#allocation2 + $0x80] sm:$0xff] %vm237_vm0, %v1693_v26 }
  0x8e   : > { %255 = vst.msk [vmem:[#allocation2 + $0x88] sm:$0xff] %vm237_vm0, %v1693_v26 }
  0x8f   : > { %256 = vst.msk [vmem:[#allocation2 + $0x90] sm:$0xff] %vm237_vm0, %v1693_v26 }
  0x90   : > { %257 = vst.msk [vmem:[#allocation2 + $0x98] sm:$0xff] %vm237_vm0, %v1693_v26 }
  0x91   : > { %258 = vst.msk [vmem:[#allocation2 + $0xa0] sm:$0xff] %vm237_vm0, %v1693_v26 }
  0x92   : > { %629 = vmatmul.f32.gmra.mxu1 %v311_v36  ;;  %742 = vmatmul.f32.gmra.mxu2 %v312_v37  ;;  %259 = vst.msk [vmem:[#allocation2 + $0xa8] sm:$0xff] %vm237_vm0, %v1693_v26 }
  0x93   : > { %260 = vst.msk [vmem:[#allocation2 + $0xb0] sm:$0xff] %vm237_vm0, %v1693_v26 }
  0x94   : > { %855 = vmatmul.f32.gmra.mxu3 %v313_v38  ;;  %v359_v38 = vld [vmem:[%s1794_s29 + $0x1c8] sm:$0xff]  ;;  %261 = vst.msk [vmem:[#allocation2 + $0xb8] sm:$0xff] %vm237_vm0, %v1693_v26 }
  0x95   : > { %262 = vst.msk [vmem:[#allocation2 + $0xc0] sm:$0xff] %vm237_vm0, %v1693_v26 }
  0x96   : > { %263 = vst.msk [vmem:[#allocation2 + $0xc8] sm:$0xff] %vm237_vm0, %v1693_v26 }
  0x97   : > { %264 = vst.msk [vmem:[#allocation2 + $0xd0] sm:$0xff] %vm237_vm0, %v1693_v26 }
  0x98   : > { %265 = vst.msk [vmem:[#allocation2 + $0xd8] sm:$0xff] %vm237_vm0, %v1693_v26 }
  0x99   : > { %266 = vst.msk [vmem:[#allocation2 + $0xe0] sm:$0xff] %vm237_vm0, %v1693_v26 }
  0x9a   : > { %632 = vmatmul.f32.gmra.mxu1 %v315_v40  ;;  %745 = vmatmul.f32.gmra.mxu2 %v316_v41  ;;  %v361_v41 = vld [vmem:[%s1794_s29 + $0x1d8] sm:$0xff]  ;;  %267 = vst.msk [vmem:[#allocation2 + $0xe8] sm:$0xff] %vm237_vm0, %v1693_v26 }
  0x9b   : > { %268 = vst.msk [vmem:[#allocation2 + $0xf0] sm:$0xff] %vm237_vm0, %v1693_v26 }
  0x9c   : > { %858 = vmatmul.f32.gmra.mxu3 %v317_v42  ;;  %269 = vst.msk [vmem:[#allocation2 + $0xf8] sm:$0xff] %vm237_vm0, %v1693_v26  ;;  %v377_v26 = vld [vmem:[%s1794_s29 + $0x258] sm:$0xff] }
  0xa2   : > { %635 = vmatmul.f32.gmra.mxu1 %v319_v44  ;;  %748 = vmatmul.f32.gmra.mxu2 %v320_v45  ;;  %v363_v45 = vld [vmem:[%s1794_s29 + $0x1e8] sm:$0xff] }
  0xa4   : > { %861 = vmatmul.f32.gmra.mxu3 %v321_v46  ;;  %v364_v46 = vld [vmem:[%s1794_s29 + $0x1f0] sm:$0xff] }
  0xaa   : > { %638 = vmatmul.f32.gmra.mxu1 %v323_v47  ;;  %751 = vmatmul.f32.gmra.mxu2 %v324_v48  ;;  %v365_v47 = vld [vmem:[%s1794_s29 + $0x1f8] sm:$0xff] }
  0xac   : > { %864 = vmatmul.f32.gmra.mxu3 %v325_v49 }
  0xb2   : > { %641 = vmatmul.f32.gmra.mxu1 %v327_v50  ;;  %754 = vmatmul.f32.gmra.mxu2 %v328_v51 }
  0xb4   : > { %867 = vmatmul.f32.gmra.mxu3 %v329_v52  ;;  %v367_v52 = vld [vmem:[%s1794_s29 + $0x208] sm:$0xff] }
  0xba   : > { %644 = vmatmul.f32.gmra.mxu1 %v331_v54  ;;  %757 = vmatmul.f32.gmra.mxu2 %v332_v55  ;;  %v369_v54 = vld [vmem:[%s1794_s29 + $0x218] sm:$0xff] }
  0xbc   : > { %870 = vmatmul.f32.gmra.mxu3 %v333_v56 }
  0xbf   : > { %v2054_v58 = vpop.f32.mrf.mxu1 }
  0xc2   : > { %647 = vmatmul.f32.gmra.mxu1 %v335_v59  ;;  %760 = vmatmul.f32.gmra.mxu2 %v336_v60 }
  0xc4   : > { %873 = vmatmul.f32.gmra.mxu3 %v337_v61  ;;  %v270_v61 = vld [vmem:[#allocation2] sm:$0xff] }
  0xc5   : > { %v2062_v63 = vpop.f32.mrf.mxu2  ;;  %v511_v40 = vpop.f32.mrf.mxu0 }
  0xc7   : > { %v2064_v0 = vpop.f32.mrf.mxu1  ;;  %v2066_v1 = vpop.f32.mrf.mxu3 }
  0xca   : > { %650 = vmatmul.f32.gmra.mxu1 %v339_v2  ;;  %763 = vmatmul.f32.gmra.mxu2 %v340_v3  ;;  %v371_v2 = vld [vmem:[%s1794_s29 + $0x228] sm:$0xff]  ;;  %v372_v3 = vld [vmem:[%s1794_s29 + $0x230] sm:$0xff] }
  0xcc   : > { %876 = vmatmul.f32.gmra.mxu3 %v341_v4 }
  0xcd   : > { %v2074_v6 = vpop.f32.mrf.mxu2  ;;  %v514_v48 = vpop.f32.mrf.mxu0 }
  0xcf   : > { %v2076_v7 = vpop.f32.mrf.mxu1  ;;  %v2078_v8 = vpop.f32.mrf.mxu3 }
  0xd2   : > { %653 = vmatmul.f32.gmra.mxu1 %v343_v9  ;;  %766 = vmatmul.f32.gmra.mxu2 %v344_v10 }
  0xd4   : > { %879 = vmatmul.f32.gmra.mxu3 %v345_v11 }
  0xd5   : > { %v2086_v13 = vpop.f32.mrf.mxu2  ;;  %v517_v56 = vpop.f32.mrf.mxu0 }
  0xd7   : > { %v2088_v14 = vpop.f32.mrf.mxu1  ;;  %v2090_v15 = vpop.f32.mrf.mxu3 }
  0xda   : > { %656 = vmatmul.f32.gmra.mxu1 %v347_v16  ;;  %769 = vmatmul.f32.gmra.mxu2 %v348_v17 }
  0xdc   : > { %882 = vmatmul.f32.gmra.mxu3 %v349_v18  ;;  %v271_v18 = vld [vmem:[#allocation2 + $0x8] sm:$0xff] }
  0xdd   : > { %v2098_v20 = vpop.f32.mrf.mxu2  ;;  %v520_v16 = vpop.f32.mrf.mxu0 }
  0xdf   : > { %v2100_v21 = vpop.f32.mrf.mxu1  ;;  %v2102_v22 = vpop.f32.mrf.mxu3 }
  0xe2   : > { %659 = vmatmul.f32.gmra.mxu1 %v351_v23  ;;  %772 = vmatmul.f32.gmra.mxu2 %v352_v24  ;;  %v375_v23 = vld [vmem:[%s1794_s29 + $0x248] sm:$0xff]  ;;  %v376_v24 = vld [vmem:[%s1794_s29 + $0x250] sm:$0xff] }
  0xe4   : > { %885 = vmatmul.f32.gmra.mxu3 %v353_v25 }
  0xe5   : > { %v2116_v28 = vpop.f32.mrf.mxu2 }
  0xe7   : > { %v2122_v29 = vpop.f32.mrf.mxu1  ;;  %v2124_v30 = vpop.f32.mrf.mxu3 }
  0xea   : > { %662 = vmatmul.f32.gmra.mxu1 %v355_v31  ;;  %775 = vmatmul.f32.gmra.mxu2 %v356_v32 }
  0xec   : > { %888 = vmatmul.f32.gmra.mxu3 %v357_v33 }
  0xed   : > { %v2144_v35 = vpop.f32.mrf.mxu2 }
  0xef   : > { %v2150_v36 = vpop.f32.mrf.mxu1  ;;  %v2152_v37 = vpop.f32.mrf.mxu3 }
  0xf2   : > { %665 = vmatmul.f32.gmra.mxu1 %v359_v38  ;;  %778 = vmatmul.f32.gmra.mxu2 %v360_v39  ;;  %v272_v39 = vld [vmem:[#allocation2 + $0x10] sm:$0xff] }
  0xf4   : > { %891 = vmatmul.f32.gmra.mxu3 %v361_v41  ;;  %v379_v41 = vld [vmem:[%s1794_s29 + $0x268] sm:$0xff] }
  0xf5   : > { %v2169_v42 = vpop.f32.mrf.mxu2 }
  0xf7   : > { %v2175_v43 = vpop.f32.mrf.mxu1  ;;  %v2177_v44 = vpop.f32.mrf.mxu3 }
  0xfa   : > { %668 = vmatmul.f32.gmra.mxu1 %v363_v45  ;;  %781 = vmatmul.f32.gmra.mxu2 %v364_v46  ;;  %v380_v45 = vld [vmem:[%s1794_s29 + $0x270] sm:$0xff] }
  0xfc   : > { %894 = vmatmul.f32.gmra.mxu3 %v365_v47  ;;  %v523_v47 = vpop.f32.mrf.mxu0 }
  0xfd   : > { %v2194_v49 = vpop.f32.mrf.mxu2 }
  0xff   : > { %v2200_v50 = vpop.f32.mrf.mxu3  ;;  %v624_v51 = vpop.f32.mrf.mxu1 }
 0x100   : > { %v625_v55 = vadd.f32 %v624_v51, %v511_v40 }
 0x102   : > { %671 = vmatmul.f32.gmra.mxu1 %v367_v52  ;;  %784 = vmatmul.f32.gmra.mxu2 %v368_v53 }
 0x104   : > { %897 = vmatmul.f32.gmra.mxu3 %v369_v54 }
 0x105   : > { %v737_v57 = vpop.f32.mrf.mxu2 }
 0x106   : > { %v738_v59 = vadd.f32 %v737_v57, %v625_v55  ;;  %v273_v57 = vld [vmem:[#allocation2 + $0x18] sm:$0xff] }
 0x107   : > { %v627_v60 = vpop.f32.mrf.mxu1  ;;  %v850_v62 = vpop.f32.mrf.mxu3 }
 0x108   : > { %v851_v4 = vadd.f32 %v850_v62, %v738_v59  ;;  %v628_v10 = vadd.f32 %v627_v60, %v514_v48  ;;  %v381_v48 = vld [vmem:[%s1794_s29 + $0x278] sm:$0xff]  ;;  %v383_v60 = vld [vmem:[%s1794_s29 + $0x288] sm:$0xff] }
 0x10a   : > { %v946_v9 = vadd.f32 %v851_v4, %v270_v61  ;;  %674 = vmatmul.f32.gmra.mxu1 %v371_v2  ;;  %787 = vmatmul.f32.gmra.mxu2 %v372_v3  ;;  %v384_v61 = vld [vmem:[%s1794_s29 + $0x290] sm:$0xff]  ;;  %v385_v2 = vld [vmem:[%s1794_s29 + $0x298] sm:$0xff] }
 0x10c   : > { %979 = vst.msk [vmem:[#allocation2] sm:$0xff] %vm237_vm0, %v946_v9  ;;  %900 = vmatmul.f32.gmra.mxu3 %v373_v5  ;;  %v526_v5 = vpop.f32.mrf.mxu0 }
 0x10d   : > { %v740_v11 = vpop.f32.mrf.mxu2 }
 0x10e   : > { %v741_v12 = vadd.f32 %v740_v11, %v628_v10 }
 0x10f   : > { %v630_v17 = vpop.f32.mrf.mxu1  ;;  %v853_v19 = vpop.f32.mrf.mxu3 }
 0x110   : > { %v854_v25 = vadd.f32 %v853_v19, %v741_v12  ;;  %v631_v31 = vadd.f32 %v630_v17, %v517_v56  ;;  %v388_v19 = vld [vmem:[%s1794_s29 + $0x2b0] sm:$0xff] }
 0x112   : > { %v947_v27 = vadd.f32 %v854_v25, %v271_v18  ;;  %677 = vmatmul.f32.gmra.mxu1 %v375_v23  ;;  %790 = vmatmul.f32.gmra.mxu2 %v376_v24  ;;  %v387_v18 = vld [vmem:[%s1794_s29 + $0x2a8] sm:$0xff]  ;;  %v389_v24 = vld [vmem:[%s1794_s29 + $0x2b8] sm:$0xff] }
 0x113   : > { %v1014_v32 = vld [vmem:[#allocation2] sm:$0xff] }
 0x114   : > { %980 = vst.msk [vmem:[#allocation2 + $0x8] sm:$0xff] %vm237_vm0, %v947_v27  ;;  %903 = vmatmul.f32.gmra.mxu3 %v377_v26  ;;  %1422 = vmatmul.msk.f32.vlgmr.msrb.gmra.mxu0 %vm237_vm0, %v1014_v32 }
 0x115   : > { %v743_v33 = vpop.f32.mrf.mxu2 }
 0x116   : > { %v744_v34 = vadd.f32 %v743_v33, %v631_v31  ;;  %v529_v31 = vpop.f32.mrf.mxu0 }
 0x117   : > { %v633_v38 = vpop.f32.mrf.mxu1  ;;  %v856_v40 = vpop.f32.mrf.mxu3 }
 0x118   : > { %v857_v46 = vadd.f32 %v856_v40, %v744_v34  ;;  %v634_v52 = vadd.f32 %v633_v38, %v520_v16  ;;  %v274_v16 = vld [vmem:[#allocation2 + $0x20] sm:$0xff]  ;;  %v275_v38 = vld [vmem:[#allocation2 + $0x28] sm:$0xff] }
 0x119   : > { %v391_v40 = vld [vmem:[%s1794_s29 + $0x2c8] sm:$0xff] }
 0x11a   : > { %v948_v51 = vadd.f32 %v857_v46, %v272_v39  ;;  %680 = vmatmul.f32.gmra.mxu1 %v379_v41  ;;  %793 = vmatmul.f32.gmra.mxu2 %v380_v45  ;;  %v392_v41 = vld [vmem:[%s1794_s29 + $0x2d0] sm:$0xff]  ;;  %v393_v46 = vld [vmem:[%s1794_s29 + $0x2d8] sm:$0xff] }
 0x11b   : > { %v1015_v53 = vld [vmem:[#allocation2 + $0x8] sm:$0xff] }
 0x11c   : > { %981 = vst.msk [vmem:[#allocation2 + $0x10] sm:$0xff] %vm237_vm0, %v948_v51  ;;  %906 = vmatmul.f32.gmra.mxu3 %v381_v48  ;;  %1423 = vmatmul.msk.f32.gmra.mxu0 %vm237_vm0, %v1015_v53 }
 0x11d   : > { %v746_v54 = vpop.f32.mrf.mxu2 }
 0x11e   : > { %v747_v55 = vadd.f32 %v746_v54, %v634_v52  ;;  %v532_v54 = vpop.f32.mrf.mxu0 }
 0x11f   : > { %v636_v56 = vpop.f32.mrf.mxu1  ;;  %v859_v59 = vpop.f32.mrf.mxu3 }
 0x120   : > { %v860_v62 = vadd.f32 %v859_v59, %v747_v55  ;;  %v637_v4 = vadd.f32 %v636_v56, %v523_v47  ;;  %v276_v56 = vld [vmem:[#allocation2 + $0x30] sm:$0xff]  ;;  %v395_v59 = vld [vmem:[%s1794_s29 + $0x2e8] sm:$0xff] }
 0x122   : > { %v949_v3 = vadd.f32 %v860_v62, %v273_v57  ;;  %683 = vmatmul.f32.gmra.mxu1 %v383_v60  ;;  %796 = vmatmul.f32.gmra.mxu2 %v384_v61  ;;  %v396_v60 = vld [vmem:[%s1794_s29 + $0x2f0] sm:$0xff]  ;;  %v397_v62 = vld [vmem:[%s1794_s29 + $0x2f8] sm:$0xff] }
 0x123   : > { %v1016_v9 = vld [vmem:[#allocation2 + $0x10] sm:$0xff] }
 0x124   : > { %982 = vst.msk [vmem:[#allocation2 + $0x18] sm:$0xff] %vm237_vm0, %v949_v3  ;;  %909 = vmatmul.f32.gmra.mxu3 %v385_v2  ;;  %1424 = vmatmul.msk.f32.gmra.mxu0 %vm237_vm0, %v1016_v9 }
 0x125   : > { %v749_v10 = vpop.f32.mrf.mxu2 }
 0x126   : > { %v750_v11 = vadd.f32 %v749_v10, %v637_v4 }
 0x127   : > { %v639_v12 = vpop.f32.mrf.mxu1  ;;  %v862_v17 = vpop.f32.mrf.mxu3 }
 0x128   : > { %v863_v23 = vadd.f32 %v862_v17, %v750_v11  ;;  %v640_v26 = vadd.f32 %v639_v12, %v526_v5  ;;  %v277_v11 = vld [vmem:[#allocation2 + $0x38] sm:$0xff]  ;;  %v400_v17 = vld [vmem:[%s1794_s29 + $0x310] sm:$0xff] }
 0x12a   : > { %v950_v25 = vadd.f32 %v863_v23, %v274_v16  ;;  %686 = vmatmul.f32.gmra.mxu1 %v387_v18  ;;  %799 = vmatmul.f32.gmra.mxu2 %v388_v19  ;;  %v399_v16 = vld [vmem:[%s1794_s29 + $0x308] sm:$0xff]  ;;  %v401_v19 = vld [vmem:[%s1794_s29 + $0x318] sm:$0xff] }
 0x12b   : > { %v1017_v27 = vld [vmem:[#allocation2 + $0x18] sm:$0xff] }
 0x12c   : > { %983 = vst.msk [vmem:[#allocation2 + $0x20] sm:$0xff] %vm237_vm0, %v950_v25  ;;  %912 = vmatmul.f32.gmra.mxu3 %v389_v24  ;;  %1425 = vmatmul.msk.f32.gmra.mxu0 %vm237_vm0, %v1017_v27 }
 0x12d   : > { %v752_v32 = vpop.f32.mrf.mxu2 }
 0x12e   : > { %v753_v33 = vadd.f32 %v752_v32, %v640_v26  ;;  %v278_v32 = vld [vmem:[#allocation2 + $0x40] sm:$0xff] }
 0x12f   : > { %v642_v34 = vpop.f32.mrf.mxu1  ;;  %v865_v39 = vpop.f32.mrf.mxu3 }
 0x130   : > { %v866_v45 = vadd.f32 %v865_v39, %v753_v33  ;;  %v643_v48 = vadd.f32 %v642_v34, %v529_v31  ;;  %v403_v34 = vld [vmem:[%s1794_s29 + $0x328] sm:$0xff] }
 0x132   : > { %v951_v47 = vadd.f32 %v866_v45, %v275_v38  ;;  %689 = vmatmul.f32.gmra.mxu1 %v391_v40  ;;  %802 = vmatmul.f32.gmra.mxu2 %v392_v41  ;;  %v404_v38 = vld [vmem:[%s1794_s29 + $0x330] sm:$0xff]  ;;  %v405_v40 = vld [vmem:[%s1794_s29 + $0x338] sm:$0xff] }
 0x133   : > { %v1018_v51 = vld [vmem:[#allocation2 + $0x20] sm:$0xff] }
 0x134   : > { %984 = vst.msk [vmem:[#allocation2 + $0x28] sm:$0xff] %vm237_vm0, %v951_v47  ;;  %915 = vmatmul.f32.gmra.mxu3 %v393_v46  ;;  %1426 = vmatmul.msk.f32.gmra.mxu0 %vm237_vm0, %v1018_v51  ;;  %v279_v51 = vld [vmem:[#allocation2 + $0x48] sm:$0xff] }
 0x135   : > { %v755_v52 = vpop.f32.mrf.mxu2 }
 0x136   : > { %v756_v53 = vadd.f32 %v755_v52, %v643_v48 }
 0x137   : > { %v645_v55 = vpop.f32.mrf.mxu1  ;;  %v868_v57 = vpop.f32.mrf.mxu3 }
 0x138   : > { %v869_v61 = vadd.f32 %v868_v57, %v756_v53  ;;  %v646_v3 = vadd.f32 %v645_v55, %v532_v54  ;;  %v407_v53 = vld [vmem:[%s1794_s29 + $0x348] sm:$0xff]  ;;  %v408_v54 = vld [vmem:[%s1794_s29 + $0x350] sm:$0xff] }
 0x13a   : > { %v952_v2 = vadd.f32 %v869_v61, %v276_v56  ;;  %692 = vmatmul.f32.gmra.mxu1 %v395_v59  ;;  %805 = vmatmul.f32.gmra.mxu2 %v396_v60  ;;  %v409_v56 = vld [vmem:[%s1794_s29 + $0x358] sm:$0xff] }
 0x13b   : > { %v1019_v4 = vld [vmem:[#allocation2 + $0x28] sm:$0xff] }
 0x13c   : > { %985 = vst.msk [vmem:[#allocation2 + $0x30] sm:$0xff] %vm237_vm0, %v952_v2  ;;  %918 = vmatmul.f32.gmra.mxu3 %v397_v62  ;;  %1427 = vmatmul.msk.f32.gmra.mxu0 %vm237_vm0, %v1019_v4  ;;  %v280_v2 = vld [vmem:[#allocation2 + $0x50] sm:$0xff]  ;;  %v411_v4 = vld [vmem:[%s1794_s29 + $0x368] sm:$0xff] }
 0x13d   : > { %v758_v5 = vpop.f32.mrf.mxu2 }
 0x13e   : > { %v759_v9 = vadd.f32 %v758_v5, %v646_v3  ;;  %v412_v5 = vld [vmem:[%s1794_s29 + $0x370] sm:$0xff] }
 0x13f   : > { %v648_v10 = vpop.f32.mrf.mxu1  ;;  %v871_v12 = vpop.f32.mrf.mxu3 }
 0x140   : > { %v872_v18 = vadd.f32 %v871_v12, %v759_v9  ;;  %v649_v25 = vadd.f32 %v648_v10, %v2054_v58  ;;  %v413_v10 = vld [vmem:[%s1794_s29 + $0x378] sm:$0xff] }
 0x142   : > { %v953_v23 = vadd.f32 %v872_v18, %v277_v11  ;;  %695 = vmatmul.f32.gmra.mxu1 %v399_v16  ;;  %808 = vmatmul.f32.gmra.mxu2 %v400_v17 }
 0x143   : > { %v1020_v24 = vld [vmem:[#allocation2 + $0x30] sm:$0xff] }
 0x144   : > { %986 = vst.msk [vmem:[#allocation2 + $0x38] sm:$0xff] %vm237_vm0, %v953_v23  ;;  %921 = vmatmul.f32.gmra.mxu3 %v401_v19  ;;  %1428 = vmatmul.msk.f32.gmra.mxu0 %vm237_vm0, %v1020_v24  ;;  %v281_v19 = vld [vmem:[#allocation2 + $0x58] sm:$0xff]  ;;  %v415_v24 = vld [vmem:[%s1794_s29 + $0x388] sm:$0xff] }
 0x145   : > { %v761_v26 = vpop.f32.mrf.mxu2 }
 0x146   : > { %v762_v27 = vadd.f32 %v761_v26, %v649_v25  ;;  %v416_v25 = vld [vmem:[%s1794_s29 + $0x390] sm:$0xff] }
 0x147   : > { %v651_v31 = vpop.f32.mrf.mxu1  ;;  %v874_v33 = vpop.f32.mrf.mxu3 }
 0x148   : > { %v875_v39 = vadd.f32 %v874_v33, %v762_v27  ;;  %v652_v45 = vadd.f32 %v651_v31, %v2064_v0  ;;  %v417_v27 = vld [vmem:[%s1794_s29 + $0x398] sm:$0xff] }
 0x14a   : > { %v954_v41 = vadd.f32 %v875_v39, %v278_v32  ;;  %698 = vmatmul.f32.gmra.mxu1 %v403_v34  ;;  %811 = vmatmul.f32.gmra.mxu2 %v404_v38  ;;  %v282_v39 = vld [vmem:[#allocation2 + $0x60] sm:$0xff] }
 0x14b   : > { %v1021_v58 = vld [vmem:[#allocation2 + $0x38] sm:$0xff] }
 0x14c   : > { %987 = vst.msk [vmem:[#allocation2 + $0x40] sm:$0xff] %vm237_vm0, %v954_v41  ;;  %924 = vmatmul.f32.gmra.mxu3 %v405_v40  ;;  %1429 = vmatmul.msk.f32.gmra.mxu0 %vm237_vm0, %v1021_v58  ;;  %v419_v41 = vld [vmem:[%s1794_s29 + $0x3a8] sm:$0xff]  ;;  %v420_v58 = vld [vmem:[%s1794_s29 + $0x3b0] sm:$0xff] }
 0x14d   : > { %v764_v46 = vpop.f32.mrf.mxu2 }
 0x14e   : > { %v765_v47 = vadd.f32 %v764_v46, %v652_v45  ;;  %v421_v46 = vld [vmem:[%s1794_s29 + $0x3b8] sm:$0xff] }
 0x14f   : > { %v654_v48 = vpop.f32.mrf.mxu1  ;;  %v877_v52 = vpop.f32.mrf.mxu3 }
 0x150   : > { %v878_v55 = vadd.f32 %v877_v52, %v765_v47  ;;  %v655_v59 = vadd.f32 %v654_v48, %v2076_v7 }
 0x152   : > { %v955_v57 = vadd.f32 %v878_v55, %v279_v51  ;;  %701 = vmatmul.f32.gmra.mxu1 %v407_v53  ;;  %814 = vmatmul.f32.gmra.mxu2 %v408_v54  ;;  %v283_v54 = vld [vmem:[#allocation2 + $0x68] sm:$0xff] }
 0x153   : > { %v1022_v0 = vld [vmem:[#allocation2 + $0x40] sm:$0xff] }
 0x154   : > { %988 = vst.msk [vmem:[#allocation2 + $0x48] sm:$0xff] %vm237_vm0, %v955_v57  ;;  %927 = vmatmul.f32.gmra.mxu3 %v409_v56  ;;  %1430 = vmatmul.msk.f32.gmra.mxu0 %vm237_vm0, %v1022_v0  ;;  %v423_v56 = vld [vmem:[%s1794_s29 + $0x3c8] sm:$0xff]  ;;  %v424_v57 = vld [vmem:[%s1794_s29 + $0x3d0] sm:$0xff] }
 0x155   : > { %v767_v60 = vpop.f32.mrf.mxu2 }
 0x156   : > { %v768_v61 = vadd.f32 %v767_v60, %v655_v59  ;;  %v425_v59 = vld [vmem:[%s1794_s29 + $0x3d8] sm:$0xff] }
 0x157   : > { %v657_v62 = vpop.f32.mrf.mxu1  ;;  %v880_v3 = vpop.f32.mrf.mxu3 }
 0x158   : > { %v881_v9 = vadd.f32 %v880_v3, %v768_v61  ;;  %v658_v12 = vadd.f32 %v657_v62, %v2088_v14 }
 0x15a   : > { %v956_v11 = vadd.f32 %v881_v9, %v280_v2  ;;  %704 = vmatmul.f32.gmra.mxu1 %v411_v4  ;;  %817 = vmatmul.f32.gmra.mxu2 %v412_v5  ;;  %v284_v4 = vld [vmem:[#allocation2 + $0x70] sm:$0xff]  ;;  %v427_v9 = vld [vmem:[%s1794_s29 + $0x3e8] sm:$0xff] }
 0x15b   : > { %v1023_v7 = vld [vmem:[#allocation2 + $0x48] sm:$0xff] }
 0x15c   : > { %989 = vst.msk [vmem:[#allocation2 + $0x50] sm:$0xff] %vm237_vm0, %v956_v11  ;;  %930 = vmatmul.f32.gmra.mxu3 %v413_v10  ;;  %1431 = vmatmul.msk.f32.gmra.mxu0 %vm237_vm0, %v1023_v7  ;;  %v428_v10 = vld [vmem:[%s1794_s29 + $0x3f0] sm:$0xff]  ;;  %v429_v7 = vld [vmem:[%s1794_s29 + $0x3f8] sm:$0xff]  ;;  %s1421_s29 = sshll.u32 %s1790_s19, 8 }
 0x15d   : > { %v770_v16 = vpop.f32.mrf.mxu2  ;;  %s2300_s9 = scalar_lea.vmem [#allocation6], %s1421_s29 }
 0x15e   : > { %v771_v17 = vadd.f32 %v770_v16, %v658_v12  ;;  %s1308_s23 = sshll.u32 %s2300_s9, 4  ;;  %s1309_s23 = int_to_ptr.vmem [resolvable:$true] %s1308_s23 }
 0x15f   : > { %v660_v18 = vpop.f32.mrf.mxu1  ;;  %v883_v23 = vpop.f32.mrf.mxu3 }
 0x160   : > { %v884_v26 = vadd.f32 %v883_v23, %v771_v17  ;;  %v661_v32 = vadd.f32 %v660_v18, %v2100_v21  ;;  %v285_v23 = vld [vmem:[#allocation2 + $0x78] sm:$0xff] }
 0x162   : > { %v957_v31 = vadd.f32 %v884_v26, %v281_v19  ;;  %707 = vmatmul.f32.gmra.mxu1 %v415_v24  ;;  %820 = vmatmul.f32.gmra.mxu2 %v416_v25 }
 0x163   : > { %v1024_v14 = vld [vmem:[#allocation2 + $0x50] sm:$0xff] }
 0x164   : > { %990 = vst.msk [vmem:[#allocation2 + $0x58] sm:$0xff] %vm237_vm0, %v957_v31  ;;  %933 = vmatmul.f32.gmra.mxu3 %v417_v27  ;;  %1432 = vmatmul.msk.f32.gmra.mxu0 %vm237_vm0, %v1024_v14 }
 0x165   : > { %v773_v33 = vpop.f32.mrf.mxu2 }
 0x166   : > { %v774_v34 = vadd.f32 %v773_v33, %v661_v32  ;;  %v286_v33 = vld [vmem:[#allocation2 + $0x80] sm:$0xff] }
 0x167   : > { %v663_v38 = vpop.f32.mrf.mxu1  ;;  %v886_v40 = vpop.f32.mrf.mxu3 }
 0x168   : > { %v887_v45 = vadd.f32 %v886_v40, %v774_v34  ;;  %v664_v48 = vadd.f32 %v663_v38, %v2122_v29 }
 0x16a   : > { %v958_v47 = vadd.f32 %v887_v45, %v282_v39  ;;  %710 = vmatmul.f32.gmra.mxu1 %v419_v41  ;;  %823 = vmatmul.f32.gmra.mxu2 %v420_v58 }
 0x16b   : > { %v1025_v21 = vld [vmem:[#allocation2 + $0x58] sm:$0xff] }
 0x16c   : > { %991 = vst.msk [vmem:[#allocation2 + $0x60] sm:$0xff] %vm237_vm0, %v958_v47  ;;  %936 = vmatmul.f32.gmra.mxu3 %v421_v46  ;;  %1433 = vmatmul.msk.f32.gmra.mxu0 %vm237_vm0, %v1025_v21  ;;  %v287_v46 = vld [vmem:[#allocation2 + $0x88] sm:$0xff] }
 0x16d   : > { %v776_v51 = vpop.f32.mrf.mxu2 }
 0x16e   : > { %v777_v52 = vadd.f32 %v776_v51, %v664_v48 }
 0x16f   : > { %v666_v53 = vpop.f32.mrf.mxu1  ;;  %v889_v55 = vpop.f32.mrf.mxu3 }
 0x170   : > { %v890_v0 = vadd.f32 %v889_v55, %v777_v52  ;;  %v667_v61 = vadd.f32 %v666_v53, %v2150_v36 }
 0x172   : > { %v959_v60 = vadd.f32 %v890_v0, %v283_v54  ;;  %713 = vmatmul.f32.gmra.mxu1 %v423_v56  ;;  %826 = vmatmul.f32.gmra.mxu2 %v424_v57  ;;  %v288_v56 = vld [vmem:[#allocation2 + $0x90] sm:$0xff] }
 0x173   : > { %v1026_v29 = vld [vmem:[#allocation2 + $0x60] sm:$0xff] }
 0x174   : > { %992 = vst.msk [vmem:[#allocation2 + $0x68] sm:$0xff] %vm237_vm0, %v959_v60  ;;  %939 = vmatmul.f32.gmra.mxu3 %v425_v59  ;;  %1434 = vmatmul.msk.f32.gmra.mxu0 %vm237_vm0, %v1026_v29 }
 0x175   : > { %v779_v62 = vpop.f32.mrf.mxu2 }
 0x176   : > { %v780_v2 = vadd.f32 %v779_v62, %v667_v61 }
 0x177   : > { %v669_v3 = vpop.f32.mrf.mxu1  ;;  %v892_v5 = vpop.f32.mrf.mxu3 }
 0x178   : > { %v893_v11 = vadd.f32 %v892_v5, %v780_v2  ;;  %v670_v36 = vadd.f32 %v669_v3, %v2175_v43  ;;  %v289_v3 = vld [vmem:[#allocation2 + $0x98] sm:$0xff] }
 0x17a   : > { %v960_v12 = vadd.f32 %v893_v11, %v284_v4  ;;  %716 = vmatmul.f32.gmra.mxu1 %v427_v9  ;;  %829 = vmatmul.f32.gmra.mxu2 %v428_v10 }
 0x17b   : > { %v1027_v16 = vld [vmem:[#allocation2 + $0x68] sm:$0xff] }
 0x17c   : > { %993 = vst.msk [vmem:[#allocation2 + $0x70] sm:$0xff] %vm237_vm0, %v960_v12  ;;  %942 = vmatmul.f32.gmra.mxu3 %v429_v7  ;;  %1435 = vmatmul.msk.f32.gmra.mxu0 %vm237_vm0, %v1027_v16 }
 0x17d   : > { %v782_v17 = vpop.f32.mrf.mxu2 }
 0x17e   : > { %v783_v18 = vadd.f32 %v782_v17, %v670_v36  ;;  %v290_v36 = vld [vmem:[#allocation2 + $0xa0] sm:$0xff] }
 0x17f   : > { %v672_v19 = vpop.f32.mrf.mxu1  ;;  %v895_v24 = vpop.f32.mrf.mxu3 }
 0x180   : > { %v896_v25 = vadd.f32 %v895_v24, %v783_v18  ;;  %v673_v31 = vadd.f32 %v672_v19, %v2062_v63 }
 0x182   : > { %v961_v26 = vadd.f32 %v896_v25, %v285_v23 }
 0x183   : > { %v1028_v27 = vld [vmem:[#allocation2 + $0x70] sm:$0xff] }
 0x184   : > { %994 = vst.msk [vmem:[#allocation2 + $0x78] sm:$0xff] %vm237_vm0, %v961_v26  ;;  %1436 = vmatmul.msk.f32.gmra.mxu0 %vm237_vm0, %v1028_v27 }
 0x185   : > { %v785_v43 = vpop.f32.mrf.mxu2 }
 0x186   : > { %v786_v14 = vadd.f32 %v785_v43, %v673_v31  ;;  %v291_v31 = vld [vmem:[#allocation2 + $0xa8] sm:$0xff] }
 0x187   : > { %v675_v32 = vpop.f32.mrf.mxu1  ;;  %v898_v34 = vpop.f32.mrf.mxu3 }
 0x188   : > { %v899_v38 = vadd.f32 %v898_v34, %v786_v14  ;;  %v676_v41 = vadd.f32 %v675_v32, %v2074_v6 }
 0x18a   : > { %v962_v39 = vadd.f32 %v899_v38, %v286_v33 }
 0x18b   : > { %v1029_v40 = vld [vmem:[#allocation2 + $0x78] sm:$0xff] }
 0x18c   : > { %995 = vst.msk [vmem:[#allocation2 + $0x80] sm:$0xff] %vm237_vm0, %v962_v39  ;;  %1437 = vmatmul.msk.f32.gmra.mxu0 %vm237_vm0, %v1029_v40 }
 0x18d   : > { %v788_v63 = vpop.f32.mrf.mxu2 }
 0x18e   : > { %v789_v58 = vadd.f32 %v788_v63, %v676_v41  ;;  %v292_v41 = vld [vmem:[#allocation2 + $0xb0] sm:$0xff] }
 0x18f   : > { %v678_v45 = vpop.f32.mrf.mxu1  ;;  %v901_v47 = vpop.f32.mrf.mxu3 }
 0x190   : > { %v902_v21 = vadd.f32 %v901_v47, %v789_v58  ;;  %v679_v6 = vadd.f32 %v678_v45, %v2086_v13 }
 0x191   : > { %v1167_v48 = vpop.f32.mrf.mxu0 }
 0x192   : > { %v963_v51 = vadd.f32 %v902_v21, %v287_v46  ;;  %1263 = vst [vmem:[%s2300_s9] sm:$0xff] %v1167_v48 }
 0x193   : > { %v1030_v52 = vld [vmem:[#allocation2 + $0x80] sm:$0xff] }
 0x194   : > { %996 = vst.msk [vmem:[#allocation2 + $0x88] sm:$0xff] %vm237_vm0, %v963_v51  ;;  %1438 = vmatmul.msk.f32.gmra.mxu0 %vm237_vm0, %v1030_v52  ;;  %v293_v52 = vld [vmem:[#allocation2 + $0xb8] sm:$0xff] }
 0x195   : > { %v791_v53 = vpop.f32.mrf.mxu2 }
 0x196   : > { %v792_v54 = vadd.f32 %v791_v53, %v679_v6 }
 0x197   : > { %v681_v55 = vpop.f32.mrf.mxu1  ;;  %v904_v57 = vpop.f32.mrf.mxu3 }
 0x198   : > { %v905_v0 = vadd.f32 %v904_v57, %v792_v54  ;;  %v682_v61 = vadd.f32 %v681_v55, %v2098_v20 }
 0x199   : > { %v1170_v59 = vpop.f32.mrf.mxu0 }
 0x19a   : > { %v964_v60 = vadd.f32 %v905_v0, %v288_v56  ;;  %1264 = vst [vmem:[%s2300_s9 + $0x8] sm:$0xff] %v1170_v59 }
 0x19b   : > { %v1031_v29 = vld [vmem:[#allocation2 + $0x88] sm:$0xff] }
 0x19c   : > { %997 = vst.msk [vmem:[#allocation2 + $0x90] sm:$0xff] %vm237_vm0, %v964_v60  ;;  %1439 = vmatmul.msk.f32.gmra.mxu0 %vm237_vm0, %v1031_v29  ;;  %v294_v60 = vld [vmem:[#allocation2 + $0xc0] sm:$0xff] }
 0x19d   : > { %v794_v13 = vpop.f32.mrf.mxu2 }
 0x19e   : > { %v795_v62 = vadd.f32 %v794_v13, %v682_v61 }
 0x19f   : > { %v684_v2 = vpop.f32.mrf.mxu1  ;;  %v907_v4 = vpop.f32.mrf.mxu3 }
 0x1a0   : > { %v908_v5 = vadd.f32 %v907_v4, %v795_v62  ;;  %v685_v7 = vadd.f32 %v684_v2, %v2116_v28 }
 0x1a1   : > { %v1173_v9 = vpop.f32.mrf.mxu0 }
 0x1a2   : > { %v965_v10 = vadd.f32 %v908_v5, %v289_v3  ;;  %1265 = vst [vmem:[%s2300_s9 + $0x10] sm:$0xff] %v1173_v9  ;;  %v295_v9 = vld [vmem:[#allocation2 + $0xc8] sm:$0xff] }
 0x1a3   : > { %v1032_v11 = vld [vmem:[#allocation2 + $0x90] sm:$0xff] }
 0x1a4   : > { %998 = vst.msk [vmem:[#allocation2 + $0x98] sm:$0xff] %vm237_vm0, %v965_v10  ;;  %1440 = vmatmul.msk.f32.gmra.mxu0 %vm237_vm0, %v1032_v11 }
 0x1a5   : > { %v797_v20 = vpop.f32.mrf.mxu2 }
 0x1a6   : > { %v798_v12 = vadd.f32 %v797_v20, %v685_v7 }
 0x1a7   : > { %v687_v16 = vpop.f32.mrf.mxu1  ;;  %v910_v17 = vpop.f32.mrf.mxu3 }
 0x1a8   : > { %v911_v18 = vadd.f32 %v910_v17, %v798_v12  ;;  %v688_v25 = vadd.f32 %v687_v16, %v2144_v35 }
 0x1a9   : > { %v1176_v19 = vpop.f32.mrf.mxu0 }
 0x1aa   : > { %v966_v23 = vadd.f32 %v911_v18, %v290_v36  ;;  %1266 = vst [vmem:[%s2300_s9 + $0x18] sm:$0xff] %v1176_v19  ;;  %v296_v18 = vld [vmem:[#allocation2 + $0xd0] sm:$0xff] }
 0x1ab   : > { %v1033_v24 = vld [vmem:[#allocation2 + $0x98] sm:$0xff] }
 0x1ac   : > { %999 = vst.msk [vmem:[#allocation2 + $0xa0] sm:$0xff] %vm237_vm0, %v966_v23  ;;  %1441 = vmatmul.msk.f32.gmra.mxu0 %vm237_vm0, %v1033_v24 }
 0x1ad   : > { %v800_v28 = vpop.f32.mrf.mxu2 }
 0x1ae   : > { %v801_v26 = vadd.f32 %v800_v28, %v688_v25 }
 0x1af   : > { %v690_v27 = vpop.f32.mrf.mxu1  ;;  %v913_v43 = vpop.f32.mrf.mxu3 }
 0x1b0   : > { %v914_v14 = vadd.f32 %v913_v43, %v801_v26  ;;  %v691_v38 = vadd.f32 %v690_v27, %v2169_v42  ;;  %v297_v43 = vld [vmem:[#allocation2 + $0xd8] sm:$0xff] }
 0x1b1   : > { %v1179_v32 = vpop.f32.mrf.mxu0 }
 0x1b2   : > { %v967_v33 = vadd.f32 %v914_v14, %v291_v31  ;;  %1267 = vst [vmem:[%s2300_s9 + $0x20] sm:$0xff] %v1179_v32 }
 0x1b3   : > { %v1034_v34 = vld [vmem:[#allocation2 + $0xa0] sm:$0xff] }
 0x1b4   : > { %1000 = vst.msk [vmem:[#allocation2 + $0xa8] sm:$0xff] %vm237_vm0, %v967_v33  ;;  %1442 = vmatmul.msk.f32.gmra.mxu0 %vm237_vm0, %v1034_v34 }
 0x1b5   : > { %v803_v35 = vpop.f32.mrf.mxu2 }
 0x1b6   : > { %v804_v39 = vadd.f32 %v803_v35, %v691_v38 }
 0x1b7   : > { %v693_v40 = vpop.f32.mrf.mxu1  ;;  %v916_v63 = vpop.f32.mrf.mxu3 }
 0x1b8   : > { %v917_v58 = vadd.f32 %v916_v63, %v804_v39  ;;  %v694_v21 = vadd.f32 %v693_v40, %v2194_v49 }
 0x1b9   : > { %v1182_v45 = vpop.f32.mrf.mxu0 }
 0x1ba   : > { %v968_v46 = vadd.f32 %v917_v58, %v292_v41  ;;  %1268 = vst [vmem:[%s2300_s9 + $0x28] sm:$0xff] %v1182_v45  ;;  %v298_v41 = vld [vmem:[#allocation2 + $0xe0] sm:$0xff] }
 0x1bb   : > { %v1035_v47 = vld [vmem:[#allocation2 + $0xa8] sm:$0xff] }
 0x1bc   : > { %1001 = vst.msk [vmem:[#allocation2 + $0xb0] sm:$0xff] %vm237_vm0, %v968_v46  ;;  %1443 = vmatmul.msk.f32.gmra.mxu0 %vm237_vm0, %v1035_v47 }
 0x1bd   : > { %v806_v42 = vpop.f32.mrf.mxu2 }
 0x1be   : > { %v807_v48 = vadd.f32 %v806_v42, %v694_v21 }
 0x1bf   : > { %v696_v51 = vpop.f32.mrf.mxu1  ;;  %v919_v6 = vpop.f32.mrf.mxu3 }
 0x1c0   : > { %v920_v53 = vadd.f32 %v919_v6, %v807_v48  ;;  %v697_v57 = vadd.f32 %v696_v51, %v2066_v1  ;;  %v299_v51 = vld [vmem:[#allocation2 + $0xe8] sm:$0xff] }
 0x1c1   : > { %v1185_v54 = vpop.f32.mrf.mxu0 }
 0x1c2   : > { %v969_v55 = vadd.f32 %v920_v53, %v293_v52  ;;  %1269 = vst [vmem:[%s2300_s9 + $0x30] sm:$0xff] %v1185_v54 }
 0x1c3   : > { %v1036_v56 = vld [vmem:[#allocation2 + $0xb0] sm:$0xff] }
 0x1c4   : > { %1002 = vst.msk [vmem:[#allocation2 + $0xb8] sm:$0xff] %vm237_vm0, %v969_v55  ;;  %1444 = vmatmul.msk.f32.gmra.mxu0 %vm237_vm0, %v1036_v56 }
 0x1c5   : > { %v809_v49 = vpop.f32.mrf.mxu2 }
 0x1c6   : > { %v810_v0 = vadd.f32 %v809_v49, %v697_v57  ;;  %v300_v49 = vld [vmem:[#allocation2 + $0xf0] sm:$0xff] }
 0x1c7   : > { %v699_v59 = vpop.f32.mrf.mxu1  ;;  %v922_v29 = vpop.f32.mrf.mxu3 }
 0x1c8   : > { %v923_v61 = vadd.f32 %v922_v29, %v810_v0  ;;  %v700_v3 = vadd.f32 %v699_v59, %v2078_v8 }
 0x1c9   : > { %v1188_v13 = vpop.f32.mrf.mxu0 }
 0x1ca   : > { %v970_v62 = vadd.f32 %v923_v61, %v294_v60  ;;  %1270 = vst [vmem:[%s2300_s9 + $0x38] sm:$0xff] %v1188_v13 }
 0x1cb   : > { %v1037_v2 = vld [vmem:[#allocation2 + $0xb8] sm:$0xff] }
 0x1cc   : > { %1003 = vst.msk [vmem:[#allocation2 + $0xc0] sm:$0xff] %vm237_vm0, %v970_v62  ;;  %1445 = vmatmul.msk.f32.gmra.mxu0 %vm237_vm0, %v1037_v2 }
 0x1cd   : > { %v812_v1 = vpop.f32.mrf.mxu2 }
 0x1ce   : > { %v813_v4 = vadd.f32 %v812_v1, %v700_v3  ;;  %v301_v3 = vld [vmem:[#allocation2 + $0xf8] sm:$0xff] }
 0x1cf   : > { %v702_v5 = vpop.f32.mrf.mxu1  ;;  %v925_v10 = vpop.f32.mrf.mxu3 }
 0x1d0   : > { %v926_v11 = vadd.f32 %v925_v10, %v813_v4  ;;  %v703_v16 = vadd.f32 %v702_v5, %v2090_v15 }
 0x1d1   : > { %v1191_v7 = vpop.f32.mrf.mxu0 }
 0x1d2   : > { %v971_v20 = vadd.f32 %v926_v11, %v295_v9  ;;  %1271 = vst [vmem:[%s2300_s9 + $0x40] sm:$0xff] %v1191_v7 }
 0x1d3   : > { %v1038_v12 = vld [vmem:[#allocation2 + $0xc0] sm:$0xff] }
 0x1d4   : > { %1004 = vst.msk [vmem:[#allocation2 + $0xc8] sm:$0xff] %vm237_vm0, %v971_v20  ;;  %1446 = vmatmul.msk.f32.gmra.mxu0 %vm237_vm0, %v1038_v12 }
 0x1d5   : > { %v815_v8 = vpop.f32.mrf.mxu2 }
 0x1d6   : > { %v816_v36 = vadd.f32 %v815_v8, %v703_v16 }
 0x1d7   : > { %v705_v17 = vpop.f32.mrf.mxu1  ;;  %v928_v19 = vpop.f32.mrf.mxu3 }
 0x1d8   : > { %v929_v23 = vadd.f32 %v928_v19, %v816_v36  ;;  %v706_v26 = vadd.f32 %v705_v17, %v2102_v22 }
 0x1d9   : > { %v1194_v24 = vpop.f32.mrf.mxu0 }
 0x1da   : > { %v972_v25 = vadd.f32 %v929_v23, %v296_v18  ;;  %1272 = vst [vmem:[%s2300_s9 + $0x48] sm:$0xff] %v1194_v24 }
 0x1db   : > { %v1039_v28 = vld [vmem:[#allocation2 + $0xc8] sm:$0xff] }
 0x1dc   : > { %1005 = vst.msk [vmem:[#allocation2 + $0xd0] sm:$0xff] %vm237_vm0, %v972_v25  ;;  %1447 = vmatmul.msk.f32.gmra.mxu0 %vm237_vm0, %v1039_v28 }
 0x1dd   : > { %v818_v15 = vpop.f32.mrf.mxu2 }
 0x1de   : > { %v819_v27 = vadd.f32 %v818_v15, %v706_v26 }
 0x1df   : > { %v708_v31 = vpop.f32.mrf.mxu1  ;;  %v931_v14 = vpop.f32.mrf.mxu3 }
 0x1e0   : > { %v932_v32 = vadd.f32 %v931_v14, %v819_v27  ;;  %v709_v35 = vadd.f32 %v708_v31, %v2124_v30 }
 0x1e1   : > { %v1197_v33 = vpop.f32.mrf.mxu0 }
 0x1e2   : > { %v973_v34 = vadd.f32 %v932_v32, %v297_v43  ;;  %1273 = vst [vmem:[%s2300_s9 + $0x50] sm:$0xff] %v1197_v33 }
 0x1e3   : > { %v1040_v38 = vld [vmem:[#allocation2 + $0xd0] sm:$0xff] }
 0x1e4   : > { %1006 = vst.msk [vmem:[#allocation2 + $0xd8] sm:$0xff] %vm237_vm0, %v973_v34  ;;  %1448 = vmatmul.msk.f32.gmra.mxu0 %vm237_vm0, %v1040_v38 }
 0x1e5   : > { %v821_v22 = vpop.f32.mrf.mxu2 }
 0x1e6   : > { %v822_v39 = vadd.f32 %v821_v22, %v709_v35 }
 0x1e7   : > { %v711_v40 = vpop.f32.mrf.mxu1  ;;  %v934_v63 = vpop.f32.mrf.mxu3 }
 0x1e8   : > { %v935_v58 = vadd.f32 %v934_v63, %v822_v39  ;;  %v712_v21 = vadd.f32 %v711_v40, %v2152_v37 }
 0x1e9   : > { %v1200_v45 = vpop.f32.mrf.mxu0 }
 0x1ea   : > { %v974_v46 = vadd.f32 %v935_v58, %v298_v41  ;;  %1274 = vst [vmem:[%s2300_s9 + $0x58] sm:$0xff] %v1200_v45 }
 0x1eb   : > { %v1041_v47 = vld [vmem:[#allocation2 + $0xd8] sm:$0xff] }
 0x1ec   : > { %1007 = vst.msk [vmem:[#allocation2 + $0xe0] sm:$0xff] %vm237_vm0, %v974_v46  ;;  %1449 = vmatmul.msk.f32.gmra.mxu0 %vm237_vm0, %v1041_v47 }
 0x1ed   : > { %v824_v30 = vpop.f32.mrf.mxu2 }
 0x1ee   : > { %v825_v42 = vadd.f32 %v824_v30, %v712_v21 }
 0x1ef   : > { %v714_v48 = vpop.f32.mrf.mxu1  ;;  %v937_v52 = vpop.f32.mrf.mxu3 }
 0x1f0   : > { %v938_v6 = vadd.f32 %v937_v52, %v825_v42  ;;  %v715_v56 = vadd.f32 %v714_v48, %v2177_v44 }
 0x1f1   : > { %v1203_v53 = vpop.f32.mrf.mxu0 }
 0x1f2   : > { %v975_v54 = vadd.f32 %v938_v6, %v299_v51  ;;  %1275 = vst [vmem:[%s2300_s9 + $0x60] sm:$0xff] %v1203_v53 }
 0x1f3   : > { %v1042_v55 = vld [vmem:[#allocation2 + $0xe0] sm:$0xff] }
 0x1f4   : > { %1008 = vst.msk [vmem:[#allocation2 + $0xe8] sm:$0xff] %vm237_vm0, %v975_v54  ;;  %1450 = vmatmul.msk.f32.gmra.mxu0 %vm237_vm0, %v1042_v55 }
 0x1f5   : > { %v827_v37 = vpop.f32.mrf.mxu2 }
 0x1f6   : > { %v828_v57 = vadd.f32 %v827_v37, %v715_v56 }
 0x1f7   : > { %v940_v0 = vpop.f32.mrf.mxu3  ;;  %v717_v60 = vpop.f32.mrf.mxu1 }
 0x1f8   : > { %v941_v59 = vadd.f32 %v940_v0, %v828_v57  ;;  %v718_v62 = vadd.f32 %v717_v60, %v2200_v50 }
 0x1f9   : > { %v1206_v29 = vpop.f32.mrf.mxu0 }
 0x1fa   : > { %v976_v61 = vadd.f32 %v941_v59, %v300_v49  ;;  %1276 = vst [vmem:[%s2300_s9 + $0x68] sm:$0xff] %v1206_v29 }
 0x1fb   : > { %v1043_v13 = vld [vmem:[#allocation2 + $0xe8] sm:$0xff] }
 0x1fc   : > { %1009 = vst.msk [vmem:[#allocation2 + $0xf0] sm:$0xff] %vm237_vm0, %v976_v61  ;;  %1451 = vmatmul.msk.f32.gmra.mxu0 %vm237_vm0, %v1043_v13 }
 0x1fd   : > { %v830_v44 = vpop.f32.mrf.mxu2 }
 0x1fe   : > { %v831_v2 = vadd.f32 %v830_v44, %v718_v62 }
 0x1ff   : > { %v943_v1 = vpop.f32.mrf.mxu3 }
 0x200   : > { %v944_v4 = vadd.f32 %v943_v1, %v831_v2 }
 0x201   : > { %v1209_v5 = vpop.f32.mrf.mxu0 }
 0x202   : > { %v977_v9 = vadd.f32 %v944_v4, %v301_v3  ;;  %1277 = vst [vmem:[%s2300_s9 + $0x70] sm:$0xff] %v1209_v5 }
 0x203   : > { %v1044_v10 = vld [vmem:[#allocation2 + $0xf0] sm:$0xff] }
 0x204   : > { %1010 = vst.msk [vmem:[#allocation2 + $0xf8] sm:$0xff] %vm237_vm0, %v977_v9  ;;  %1452 = vmatmul.msk.f32.gmra.mxu0 %vm237_vm0, %v1044_v10 }
 0x209   : > { %v1212_v50 = vpop.f32.mrf.mxu0 }
 0x20a   : > { %1278 = vst [vmem:[%s2300_s9 + $0x78] sm:$0xff] %v1212_v50 }
 0x20b   : > { %v1045_v11 = vld [vmem:[#allocation2 + $0xf8] sm:$0xff] }
 0x20c   : > { %1453 = vmatmul.msk.f32.gmra.mxu0 %vm237_vm0, %v1045_v11 }
 0x211   : > { %v1215_v7 = vpop.f32.mrf.mxu0 }
 0x212   : > { %1279 = vst [vmem:[%s2300_s9 + $0x80] sm:$0xff] %v1215_v7 }
 0x219   : > { %v1218_v20 = vpop.f32.mrf.mxu0 }
 0x21a   : > { %1280 = vst [vmem:[%s2300_s9 + $0x88] sm:$0xff] %v1218_v20 }
 0x221   : > { %v1221_v12 = vpop.f32.mrf.mxu0 }
 0x222   : > { %1281 = vst [vmem:[%s2300_s9 + $0x90] sm:$0xff] %v1221_v12 }
 0x229   : > { %v1224_v16 = vpop.f32.mrf.mxu0 }
 0x22a   : > { %1282 = vst [vmem:[%s2300_s9 + $0x98] sm:$0xff] %v1224_v16 }
 0x231   : > { %v1227_v8 = vpop.f32.mrf.mxu0 }
 0x232   : > { %1283 = vst [vmem:[%s2300_s9 + $0xa0] sm:$0xff] %v1227_v8 }
 0x239   : > { %v1230_v36 = vpop.f32.mrf.mxu0 }
 0x23a   : > { %1284 = vst [vmem:[%s2300_s9 + $0xa8] sm:$0xff] %v1230_v36 }
 0x241   : > { %v1233_v17 = vpop.f32.mrf.mxu0 }
 0x242   : > { %1285 = vst [vmem:[%s2300_s9 + $0xb0] sm:$0xff] %v1233_v17 }
 0x249   : > { %v1236_v18 = vpop.f32.mrf.mxu0 }
 0x24a   : > { %1286 = vst [vmem:[%s2300_s9 + $0xb8] sm:$0xff] %v1236_v18 }
 0x251   : > { %v1239_v19 = vpop.f32.mrf.mxu0 }
 0x252   : > { %1287 = vst [vmem:[%s2300_s9 + $0xc0] sm:$0xff] %v1239_v19 }
 0x259   : > { %v1242_v23 = vpop.f32.mrf.mxu0 }
 0x25a   : > { %1288 = vst [vmem:[%s2300_s9 + $0xc8] sm:$0xff] %v1242_v23 }
 0x261   : > { %v1245_v24 = vpop.f32.mrf.mxu0 }
 0x262   : > { %1289 = vst [vmem:[%s2300_s9 + $0xd0] sm:$0xff] %v1245_v24 }
 0x269   : > { %v1248_v25 = vpop.f32.mrf.mxu0 }
 0x26a   : > { %1290 = vst [vmem:[%s2300_s9 + $0xd8] sm:$0xff] %v1248_v25 }
 0x271   : > { %v1251_v28 = vpop.f32.mrf.mxu0 }
 0x272   : > { %1291 = vst [vmem:[%s2300_s9 + $0xe0] sm:$0xff] %v1251_v28 }
 0x279   : > { %v1254_v26 = vpop.f32.mrf.mxu0 }
 0x27a   : > { %1292 = vst [vmem:[%s2300_s9 + $0xe8] sm:$0xff] %v1254_v26 }
 0x281   : > { %v1257_v15 = vpop.f32.mrf.mxu0 }
 0x282   : > { %1293 = vst [vmem:[%s2300_s9 + $0xf0] sm:$0xff] %v1257_v15 }
 0x289   : > { %v1260_v27 = vpop.f32.mrf.mxu0 }
 0x28a   : > { %1294 = vst [vmem:[%s2300_s9 + $0xf8] sm:$0xff] %v1260_v27 }
 0x28b   : > { %1634 = shalt.err (!%p1631_p13)
}
 0x28c   : > { %s1694_s19 = smov 128   ;;  %s1695_s8 = smov 8  }
 0x28d   : > { %1512 = dma.vmem_to_hbm [thread:$0]  (%p1767_p9), %s1309_s23, 4096, %s1311_s22, %s1296_s28, %s1694_s19, %s1694_s19, %s1695_s8  }
 0x28e PF: > { %s1325_s29 = sand.u32 1, %s1669_s12   ;;  %p1519_p0 = pnand %p1414_p12, %p1774_p11 }
 0x28f   : > { %s1326_s9 = scalar_lea.sflag [#allocation5], %s1325_s29 }
 0x290   : > { %p1520_p1 = pneg %p1519_p0 }
 0x292   : > { %1664 = dma.done.wait (%p1520_p1), %s1326_s9, 4096  }
 0x293   : > { %1666 = vsyncadd (%p1520_p1), %s1326_s9, 4294963200  ;;  %s19_s17 = sadd.s32 1, %s1689_s17   ;;  %s2426_s12 = smov %s1673_s13 }
 0x294   : > { %p16_p2 = scmp.ge.s32.totalorder %s19_s17, 4   ;;  %s2427_s13 = smov %s1677_s14 }
 0x295   : > { %s2428_s14 = smov %s1772_s26  ;;  %s2429_s15 = smov %s1685_s16 }
 0x296   : > { %s2430_s16 = smov %s2432_s20  ;;  %18 = sbr.rel (!%p16_p2) target bundleno = 6 (0x6), region = 88 }
 0x29b   :  { %1332 = vsyncpa [#allocation4], 1 }
 0x29c   :  { %1334 = vsyncpa [#allocation4 + $0x1], 1 }
 0x29d   :  { %1335 = vsyncpa [#allocation5], 1 }
 0x29e   :  { %1337 = vsyncpa [#allocation5 + $0x1], 1 }

</bundles_post_ra>
